<compile_context>
chip_gen: v7x
topology: tpu7x:2x2x1
jax: 0.10.0
libtpu: 0.0.40
codegen_flags: <defaults>
</compile_context>

<pallas_src>
import functools

import jax
import jax.numpy as jnp
from jax import lax
from jax.experimental import pallas as pl
from jax.experimental.pallas import tpu as pltpu


def _round_up(x, m):
    return ((x + m - 1) // m) * m


def _cdiv(a, b):
    return (a + b - 1) // b


def _lstm_proj_kernel(g_ref, h0_ref, c0_ref, whh_ref, whr_ref,
                      y_ref, hx_ref, cx_ref,
                      h_scr, c_scr, y_scr,
                      *, h_pad, p_pad, p_out, tb, tail, unroll):
    """Grid = (n_blocks, t_chunks); time axis (inner) is sequential."""
    t_chunk = pl.program_id(1)

    # (Re)initialize the recurrent state from (h0, c0) at the first time chunk
    # of every batch block.
    @pl.when(t_chunk == 0)
    def _():
        h_scr[...] = h0_ref[...]
        c_scr[...] = c0_ref[...]

    whh = whh_ref[...]          # (P_pad, 4*H_pad) bf16 (resident block)
    whr = whr_ref[...]          # (H_pad, P_pad)   bf16 (resident block)

    if tail is not None:
        # Number of valid timesteps in this chunk (ragged tail handling).
        limit = jnp.where(t_chunk == pl.num_programs(1) - 1, tail, tb)

    def step(tt, carry):
        h_prev, c_prev = carry                      # f32 (Nb, P_pad), (Nb, H_pad)
        # gates_in already holds x_t @ W_ih^T + (b_ih + b_hh), bf16, gate-major.
        gates = g_ref[tt].astype(jnp.float32) + jnp.dot(
            h_prev.astype(jnp.bfloat16), whh,
            preferred_element_type=jnp.float32)     # (Nb, 4*H_pad) f32
        # Lane-aligned gate slabs (H_pad is a multiple of 128).
        i_g = jax.nn.sigmoid(gates[:, 0 * h_pad:1 * h_pad])
        f_g = jax.nn.sigmoid(gates[:, 1 * h_pad:2 * h_pad])
        g_g = jnp.tanh(gates[:, 2 * h_pad:3 * h_pad])
        o_g = jax.nn.sigmoid(gates[:, 3 * h_pad:4 * h_pad])
        c_t = f_g * c_prev + i_g * g_g              # (Nb, H_pad) f32
        h_full = o_g * jnp.tanh(c_t)                # (Nb, H_pad) f32
        h_t = jnp.dot(h_full.astype(jnp.bfloat16), whr,
                      preferred_element_type=jnp.float32)   # (Nb, P_pad) f32
        y_scr[tt] = h_t       # lane-dense (P_pad) staging; softmax after loop
        if tail is not None:
            keep = tt < limit
            h_t = jnp.where(keep, h_t, h_prev)
            c_t = jnp.where(keep, c_t, c_prev)
        return (h_t, c_t)

    h_fin, c_fin = lax.fori_loop(0, tb, step, (h_scr[...], c_scr[...]),
                                 unroll=unroll)
    h_scr[...] = h_fin
    c_scr[...] = c_fin

    # Bulk softmax over the whole (Tb, Nb, P_pad) chunk (lane-dense reductions),
    # then a single P-wide writeback per chunk.
    v = y_scr[...]
    if p_pad != p_out:
        lane = lax.broadcasted_iota(jnp.int32, (1, 1, p_pad), 2)
        v = jnp.where(lane < p_out, v, -1e30)
    e = jnp.exp(v - jnp.max(v, axis=-1, keepdims=True))
    inv = pl.reciprocal(jnp.sum(e, axis=-1, keepdims=True), approx=True)
    y_ref[...] = (e * inv)[:, :, :p_out].astype(y_ref.dtype)

    @pl.when(t_chunk == pl.num_programs(1) - 1)
    def _():
        hx_ref[...] = h_fin.astype(hx_ref.dtype)
        cx_ref[...] = c_fin.astype(cx_ref.dtype)


def _vmem_capacity_bytes():
    try:
        return int(pltpu.get_tpu_info().vmem_capacity_bytes)
    except Exception:
        return 64 * 1024 * 1024   # conservative: v7x per-TensorCore VMEM


def _tile_bytes(tb, nb, h_pad, p_pad, p_out):
    """Approximate VMEM footprint for one grid step (double-buffered blocks)."""
    gates = 2 * tb * nb * 4 * h_pad * 2               # bf16 input block x2
    y_out = 2 * tb * nb * p_out * 4                   # f32 output block x2
    y_scr = tb * nb * p_pad * 4                       # staging scratch
    state = nb * (p_pad + h_pad) * 4                  # h/c carry scratch
    hc_io = 2 * 2 * nb * (p_pad + h_pad) * 4          # h0/c0 in + hx/cx out x2
    wgt = 2 * 2 * (p_pad * 4 * h_pad + h_pad * p_pad) # bf16 weights x2
    return gates + y_out + y_scr + state + hc_io + wgt


def _pick_tiles(T, N, h_pad, p_pad, p_out, budget, tb_cap=32):
    """Pick (Tb, Nb): Nb splits the batch for megacore when possible and grows
    toward 128-256 to fill the MXU M dim; Tb is the largest chunk that fits the
    VMEM budget, then balanced so ragged T keeps chunks near-equal."""
    n8 = _round_up(max(N, 1), 8)
    if n8 >= 16:
        # >=2 batch blocks (v7x has 2 TensorCores); cap at 256 (MXU M dim).
        nb = min(256, _round_up((n8 + 1) // 2, 8))
    else:
        nb = n8
    while nb > 8 and _tile_bytes(1, nb, h_pad, p_pad, p_out) > budget:
        nb = max(8, _round_up(nb // 2, 8))

    tb = 1
    for cand in range(1, min(tb_cap, T) + 1):
        if _tile_bytes(cand, nb, h_pad, p_pad, p_out) <= budget:
            tb = cand
    n_chunks = _cdiv(T, tb)
    tb = _cdiv(T, n_chunks)   # balance chunk sizes (avoid tiny tail chunks)
    return tb, nb


def lstm_proj_forward(x, h0, c0, w_ih, w_hh, b_ih, b_hh, w_hr, *, tb_cap=32):
    """x: (T, N, I); h0: (1, N, P); c0: (1, N, H).
    w_ih: (4H, I), w_hh: (4H, P), b_ih/b_hh: (4H,), w_hr: (P, H) (PyTorch layout).
    Returns (softmax(y), hx, cx) matching torch.nn.LSTM(proj_size>0) + softmax."""
    T, N, I = x.shape
    H = w_ih.shape[0] // 4
    P = w_hr.shape[0]
    # Lane-aligned (128) gate/proj slabs.  Padded columns are exact zeros, so
    # the recurrence is unaffected; for realistic H (multiples of 128) this is
    # free, for tiny H the absolute overhead is negligible.
    H_pad = _round_up(H, 128)
    P_pad = _round_up(P, 128)

    vmem_cap = _vmem_capacity_bytes()
    vmem_limit = int(vmem_cap * 0.75)     # ~48 MiB on v7x, ~96 MiB on v5e/v6e
    budget = int(vmem_cap * 0.60)

    Tb, Nb = _pick_tiles(T, N, H_pad, P_pad, P, budget, tb_cap=tb_cap)
    n_blocks = _cdiv(N, Nb)
    N_pad = n_blocks * Nb
    t_chunks = _cdiv(T, Tb)
    T_pad = t_chunks * Tb
    tail = T - (t_chunks - 1) * Tb        # valid steps in the last chunk
    pad_n = N_pad - N

    # --- Hoisted input projection: one big bf16 matmul, f32 accumulation. ----
    x_p = jnp.pad(x, ((0, 0), (0, pad_n), (0, 0))) if pad_n else x
    bias = (b_ih + b_hh).astype(jnp.float32)                     # (4H,)
    wih_t = jnp.transpose(w_ih).astype(jnp.bfloat16)             # (I, 4H)
    gates = jnp.dot(x_p.reshape(T * N_pad, I).astype(jnp.bfloat16), wih_t,
                    preferred_element_type=jnp.float32)
    gates = gates.reshape(T, N_pad, 4, H) + bias.reshape(1, 1, 4, H)
    if H_pad != H:
        gates = jnp.pad(gates, ((0, 0), (0, 0), (0, 0), (0, H_pad - H)))
    if T_pad != T:
        gates = jnp.pad(gates, ((0, T_pad - T), (0, 0), (0, 0), (0, 0)))
    # Gate-major, lane-aligned, bf16 (halves HBM/VMEM vs the previous f32).
    gates_in = gates.reshape(T_pad, N_pad, 4 * H_pad).astype(jnp.bfloat16)

    # --- Weights / initial state, padded to match the gate-major layout. -----
    whh_t = jnp.transpose(w_hh).reshape(P, 4, H)                 # (P, 4, H)
    whh_t = jnp.pad(whh_t, ((0, P_pad - P), (0, 0), (0, H_pad - H)))
    whh_t = whh_t.reshape(P_pad, 4 * H_pad).astype(jnp.bfloat16)
    whr_t = jnp.pad(jnp.transpose(w_hr),
                    ((0, H_pad - H), (0, P_pad - P))).astype(jnp.bfloat16)
    h0_p = jnp.pad(h0[0].astype(jnp.float32), ((0, pad_n), (0, P_pad - P)))
    c0_p = jnp.pad(c0[0].astype(jnp.float32), ((0, pad_n), (0, H_pad - H)))

    kernel = functools.partial(
        _lstm_proj_kernel, h_pad=H_pad, p_pad=P_pad, p_out=P, tb=Tb,
        tail=(tail if tail != Tb else None), unroll=min(Tb, 8))

    grid_spec = pltpu.PrefetchScalarGridSpec(
        num_scalar_prefetch=0,
        grid=(n_blocks, t_chunks),
        in_specs=[
            pl.BlockSpec((Tb, Nb, 4 * H_pad), lambda n, t: (t, n, 0)),  # gates
            pl.BlockSpec((Nb, P_pad), lambda n, t: (n, 0)),             # h0
            pl.BlockSpec((Nb, H_pad), lambda n, t: (n, 0)),             # c0
            pl.BlockSpec((P_pad, 4 * H_pad), lambda n, t: (0, 0)),      # W_hh^T
            pl.BlockSpec((H_pad, P_pad), lambda n, t: (0, 0)),          # W_hr^T
        ],
        out_specs=[
            pl.BlockSpec((Tb, Nb, P), lambda n, t: (t, n, 0)),          # y
            pl.BlockSpec((Nb, P_pad), lambda n, t: (n, 0)),             # hx
            pl.BlockSpec((Nb, H_pad), lambda n, t: (n, 0)),             # cx
        ],
        scratch_shapes=[
            pltpu.VMEM((Nb, P_pad), jnp.float32),                       # h carry
            pltpu.VMEM((Nb, H_pad), jnp.float32),                       # c carry
            pltpu.VMEM((Tb, Nb, P_pad), jnp.float32),                   # y staging
        ],
    )

    y_p, hx_p, cx_p = pl.pallas_call(
        kernel,
        out_shape=(
            jax.ShapeDtypeStruct((T_pad, N_pad, P), jnp.float32),
            jax.ShapeDtypeStruct((N_pad, P_pad), jnp.float32),
            jax.ShapeDtypeStruct((N_pad, H_pad), jnp.float32),
        ),
        grid_spec=grid_spec,
        compiler_params=pltpu.CompilerParams(
            dimension_semantics=("parallel", "arbitrary"),
            vmem_limit_bytes=vmem_limit),
    )(gates_in, h0_p, c0_p, whh_t, whr_t)

    # Strip time/batch/lane padding; restore the (num_layers=1) leading axis.
    y = y_p[:T, :N, :]
    hx = hx_p[None, :N, :P]
    cx = cx_p[None, :N, :H]
    return y, hx, cx


def lstm_proj_reference(x, h0, c0, w_ih, w_hh, b_ih, b_hh, w_hr):
    """Pure-JAX f32 reference mirroring torch.nn.LSTM(proj_size>0) + softmax."""
    H = w_ih.shape[0] // 4
    h = h0[0]
    c = c0[0]

    def step(carry, x_t):
        h, c = carry
        gates = x_t @ w_ih.T + b_ih + h @ w_hh.T + b_hh
        i = jax.nn.sigmoid(gates[:, 0 * H:1 * H])
        f = jax.nn.sigmoid(gates[:, 1 * H:2 * H])
        g = jnp.tanh(gates[:, 2 * H:3 * H])
        o = jax.nn.sigmoid(gates[:, 3 * H:4 * H])
        c_new = f * c + i * g
        h_full = o * jnp.tanh(c_new)
        h_new = h_full @ w_hr.T
        return (h_new, c_new), h_new

    (h_fin, c_fin), ys = jax.lax.scan(step, (h, c), x)
    y = jax.nn.softmax(ys, axis=-1)
    return y, h_fin[None], c_fin[None]


if __name__ == "__main__":
    # Small shapes consistent with the module's forward.
    T, N = 8, 4
    input_size, hidden_size, proj_size = 16, 32, 8

    key = jax.random.PRNGKey(0)
    kx, kh, kc, k1, k2, k3, k4, k5 = jax.random.split(key, 8)

    scale = 1.0 / jnp.sqrt(hidden_size)
    # Deterministic synthetic parameters (PyTorch nn.LSTM parameter shapes).
    w_ih = jax.random.uniform(k1, (4 * hidden_size, input_size), jnp.float32, -scale, scale)
    w_hh = jax.random.uniform(k2, (4 * hidden_size, proj_size), jnp.float32, -scale, scale)
    b_ih = jax.random.uniform(k3, (4 * hidden_size,), jnp.float32, -scale, scale)
    b_hh = jax.random.uniform(k4, (4 * hidden_size,), jnp.float32, -scale, scale)
    w_hr = jax.random.uniform(k5, (proj_size, hidden_size), jnp.float32, -scale, scale)

    x = jax.random.normal(kx, (T, N, input_size), jnp.float32)
    h0 = jax.random.normal(kh, (1, N, proj_size), jnp.float32)
    c0 = jax.random.normal(kc, (1, N, hidden_size), jnp.float32)

    y, hx, cx = lstm_proj_forward(x, h0, c0, w_ih, w_hh, b_ih, b_hh, w_hr)
    jax.block_until_ready((y, hx, cx))

    y_ref, hx_ref, cx_ref = lstm_proj_reference(x, h0, c0, w_ih, w_hh, b_ih, b_hh, w_hr)
    # Tolerances account for bf16 MXU inputs / bf16 gates_in (f32 accumulation)
    # vs the pure-f32 reference.
    assert jnp.allclose(y, y_ref, rtol=3e-2, atol=3e-2)
    assert jnp.allclose(hx, hx_ref, rtol=3e-2, atol=3e-2)
    assert jnp.allclose(cx, cx_ref, rtol=3e-2, atol=3e-2)

    print("KERNEL_OK")
</pallas_src>

<mosaic_0001>
module attributes {stable_mosaic.version = 11 : i64} {
  func.func @_lstm_proj_kernel(%arg0: i32, %arg1: i32, %arg2: memref<8x8x512xbf16, #tpu.memory_space<vmem>>, %arg3: memref<8x128xf32, #tpu.memory_space<vmem>>, %arg4: memref<8x128xf32, #tpu.memory_space<vmem>>, %arg5: memref<128x512xbf16, #tpu.memory_space<vmem>>, %arg6: memref<128x128xbf16, #tpu.memory_space<vmem>>, %arg7: memref<8x8x8xf32, #tpu.memory_space<vmem>>, %arg8: memref<8x128xf32, #tpu.memory_space<vmem>>, %arg9: memref<8x128xf32, #tpu.memory_space<vmem>>, %arg10: memref<8x128xf32, #tpu.memory_space<vmem>>, %arg11: memref<8x128xf32, #tpu.memory_space<vmem>>, %arg12: memref<8x8x128xf32, #tpu.memory_space<vmem>>) attributes {dimension_semantics = [#tpu.dimension_semantics<parallel>, #tpu.dimension_semantics<arbitrary>], iteration_bounds = array<i64: 1, 1>, scalar_prefetch = 0 : i64, scratch_operands = 3 : i64, tpu.core_type = #tpu.core_type<tc>, window_params = [{transform_indices = @transform_0, window_bounds = array<i64: 8, 8, 512>}, {transform_indices = @transform_1, window_bounds = array<i64: 8, 128>}, {transform_indices = @transform_2, window_bounds = array<i64: 8, 128>}, {pipeline_mode = #tpu.pipeline_mode<synchronous>, transform_indices = @transform_3, window_bounds = array<i64: 128, 512>}, {pipeline_mode = #tpu.pipeline_mode<synchronous>, transform_indices = @transform_4, window_bounds = array<i64: 128, 128>}, {transform_indices = @transform_5, window_bounds = array<i64: 8, 8, 8>}, {transform_indices = @transform_6, window_bounds = array<i64: 8, 128>}, {transform_indices = @transform_7, window_bounds = array<i64: 8, 128>}]} {
    %c0_i32 = arith.constant 0 : i32
    %0 = arith.cmpi eq, %arg1, %c0_i32 : i32
    %1 = arith.extui %0 : i1 to i32
    %c0_i32_0 = arith.constant 0 : i32
    %2 = arith.cmpi ne, %1, %c0_i32_0 : i32
    scf.if %2 {
      %c0_96 = arith.constant 0 : index
      %c0_97 = arith.constant 0 : index
      %336 = vector.load %arg3[%c0_96, %c0_97] : memref<8x128xf32, #tpu.memory_space<vmem>>, vector<8x128xf32>
      %c0_98 = arith.constant 0 : index
      %c0_99 = arith.constant 0 : index
      %337 = vector.load %arg10[%c0_98, %c0_99] : memref<8x128xf32, #tpu.memory_space<vmem>>, vector<8x128xf32>
      tpu.vector_store %arg10[%c0_98, %c0_99], %336 {strides = array<i32>} : memref<8x128xf32, #tpu.memory_space<vmem>>, vector<8x128xf32>,
      %c0_100 = arith.constant 0 : index
      %c0_101 = arith.constant 0 : index
      %338 = vector.load %arg4[%c0_100, %c0_101] : memref<8x128xf32, #tpu.memory_space<vmem>>, vector<8x128xf32>
      %c0_102 = arith.constant 0 : index
      %c0_103 = arith.constant 0 : index
      %339 = vector.load %arg11[%c0_102, %c0_103] : memref<8x128xf32, #tpu.memory_space<vmem>>, vector<8x128xf32>
      tpu.vector_store %arg11[%c0_102, %c0_103], %338 {strides = array<i32>} : memref<8x128xf32, #tpu.memory_space<vmem>>, vector<8x128xf32>,
    } else {
    }
    %c0 = arith.constant 0 : index
    %c0_1 = arith.constant 0 : index
    %3 = vector.load %arg5[%c0, %c0_1] : memref<128x512xbf16, #tpu.memory_space<vmem>>, vector<128x512xbf16>
    %c0_2 = arith.constant 0 : index
    %c0_3 = arith.constant 0 : index
    %4 = vector.load %arg6[%c0_2, %c0_3] : memref<128x128xbf16, #tpu.memory_space<vmem>>, vector<128x128xbf16>
    %c0_4 = arith.constant 0 : index
    %c0_5 = arith.constant 0 : index
    %5 = vector.load %arg10[%c0_4, %c0_5] : memref<8x128xf32, #tpu.memory_space<vmem>>, vector<8x128xf32>
    %c0_6 = arith.constant 0 : index
    %c0_7 = arith.constant 0 : index
    %6 = vector.load %arg11[%c0_6, %c0_7] : memref<8x128xf32, #tpu.memory_space<vmem>>, vector<8x128xf32>
    %c0_i32_8 = arith.constant 0 : i32
    %7 = arith.index_cast %c0_i32_8 : i32 to index
    %c0_9 = arith.constant 0 : index
    %c0_10 = arith.constant 0 : index
    %8 = vector.load %arg2[%7, %c0_9, %c0_10] : memref<8x8x512xbf16, #tpu.memory_space<vmem>>, vector<1x8x512xbf16>
    %9 = vector.shape_cast %8 : vector<1x8x512xbf16> to vector<8x512xbf16>
    %10 = arith.extf %9 : vector<8x512xbf16> to vector<8x512xf32>
    %11 = arith.truncf %5 : vector<8x128xf32> to vector<8x128xbf16>
    %cst = arith.constant dense<0.000000e+00> : vector<8x512xf32>
    %12 = tpu.matmul %11, %3, %cst {dimension_numbers = #tpu.dot_dimension_numbers<[1], [0], [0], [1], [0, 0, 1, 1], [], []>} : vector<8x128xbf16>, vector<128x512xbf16>, vector<8x512xf32> -> vector<8x512xf32>
    %13 = arith.addf %10, %12 : vector<8x512xf32>
    %14 = vector.extract_strided_slice %13 {offsets = [0, 0], sizes = [8, 128], strides = [1, 1]} : vector<8x512xf32> to vector<8x128xf32>
    %15 = arith.negf %14 : vector<8x128xf32>
    %16 = math.exp %15 : vector<8x128xf32>
    %cst_11 = arith.constant 1.000000e+00 : f32
    %17 = vector.broadcast %cst_11 : f32 to vector<8x128xf32>
    %18 = arith.addf %17, %16 : vector<8x128xf32>
    %19 = arith.divf %17, %18 : vector<8x128xf32>
    %20 = vector.extract_strided_slice %13 {offsets = [0, 128], sizes = [8, 128], strides = [1, 1]} : vector<8x512xf32> to vector<8x128xf32>
    %21 = arith.negf %20 : vector<8x128xf32>
    %22 = math.exp %21 : vector<8x128xf32>
    %cst_12 = arith.constant 1.000000e+00 : f32
    %23 = vector.broadcast %cst_12 : f32 to vector<8x128xf32>
    %24 = arith.addf %23, %22 : vector<8x128xf32>
    %25 = arith.divf %23, %24 : vector<8x128xf32>
    %26 = vector.extract_strided_slice %13 {offsets = [0, 256], sizes = [8, 128], strides = [1, 1]} : vector<8x512xf32> to vector<8x128xf32>
    %27 = math.tanh %26 : vector<8x128xf32>
    %28 = vector.extract_strided_slice %13 {offsets = [0, 384], sizes = [8, 128], strides = [1, 1]} : vector<8x512xf32> to vector<8x128xf32>
    %29 = arith.negf %28 : vector<8x128xf32>
    %30 = math.exp %29 : vector<8x128xf32>
    %cst_13 = arith.constant 1.000000e+00 : f32
    %31 = vector.broadcast %cst_13 : f32 to vector<8x128xf32>
    %32 = arith.addf %31, %30 : vector<8x128xf32>
    %33 = arith.divf %31, %32 : vector<8x128xf32>
    %34 = arith.mulf %25, %6 : vector<8x128xf32>
    %35 = arith.mulf %19, %27 : vector<8x128xf32>
    %36 = arith.addf %34, %35 : vector<8x128xf32>
    %37 = math.tanh %36 : vector<8x128xf32>
    %38 = arith.mulf %33, %37 : vector<8x128xf32>
    %39 = arith.truncf %38 : vector<8x128xf32> to vector<8x128xbf16>
    %cst_14 = arith.constant dense<0.000000e+00> : vector<8x128xf32>
    %40 = tpu.matmul %39, %4, %cst_14 {dimension_numbers = #tpu.dot_dimension_numbers<[1], [0], [0], [1], [0, 0, 1, 1], [], []>} : vector<8x128xbf16>, vector<128x128xbf16>, vector<8x128xf32> -> vector<8x128xf32>
    %41 = arith.index_cast %c0_i32_8 : i32 to index
    %c0_15 = arith.constant 0 : index
    %c0_16 = arith.constant 0 : index
    %42 = vector.load %arg12[%41, %c0_15, %c0_16] : memref<8x8x128xf32, #tpu.memory_space<vmem>>, vector<1x8x128xf32>
    %43 = vector.shape_cast %42 : vector<1x8x128xf32> to vector<8x128xf32>
    %44 = vector.shape_cast %40 : vector<8x128xf32> to vector<1x8x128xf32>
    tpu.vector_store %arg12[%41, %c0_15, %c0_16], %44 {strides = array<i32>} : memref<8x8x128xf32, #tpu.memory_space<vmem>>, vector<1x8x128xf32>,
    %c1_i32 = arith.constant 1 : i32
    %45 = arith.index_cast %c1_i32 : i32 to index
    %c0_17 = arith.constant 0 : index
    %c0_18 = arith.constant 0 : index
    %46 = vector.load %arg2[%45, %c0_17, %c0_18] : memref<8x8x512xbf16, #tpu.memory_space<vmem>>, vector<1x8x512xbf16>
    %47 = vector.shape_cast %46 : vector<1x8x512xbf16> to vector<8x512xbf16>
    %48 = arith.extf %47 : vector<8x512xbf16> to vector<8x512xf32>
    %49 = arith.truncf %40 : vector<8x128xf32> to vector<8x128xbf16>
    %cst_19 = arith.constant dense<0.000000e+00> : vector<8x512xf32>
    %50 = tpu.matmul %49, %3, %cst_19 {dimension_numbers = #tpu.dot_dimension_numbers<[1], [0], [0], [1], [0, 0, 1, 1], [], []>} : vector<8x128xbf16>, vector<128x512xbf16>, vector<8x512xf32> -> vector<8x512xf32>
    %51 = arith.addf %48, %50 : vector<8x512xf32>
    %52 = vector.extract_strided_slice %51 {offsets = [0, 0], sizes = [8, 128], strides = [1, 1]} : vector<8x512xf32> to vector<8x128xf32>
    %53 = arith.negf %52 : vector<8x128xf32>
    %54 = math.exp %53 : vector<8x128xf32>
    %cst_20 = arith.constant 1.000000e+00 : f32
    %55 = vector.broadcast %cst_20 : f32 to vector<8x128xf32>
    %56 = arith.addf %55, %54 : vector<8x128xf32>
    %57 = arith.divf %55, %56 : vector<8x128xf32>
    %58 = vector.extract_strided_slice %51 {offsets = [0, 128], sizes = [8, 128], strides = [1, 1]} : vector<8x512xf32> to vector<8x128xf32>
    %59 = arith.negf %58 : vector<8x128xf32>
    %60 = math.exp %59 : vector<8x128xf32>
    %cst_21 = arith.constant 1.000000e+00 : f32
    %61 = vector.broadcast %cst_21 : f32 to vector<8x128xf32>
    %62 = arith.addf %61, %60 : vector<8x128xf32>
    %63 = arith.divf %61, %62 : vector<8x128xf32>
    %64 = vector.extract_strided_slice %51 {offsets = [0, 256], sizes = [8, 128], strides = [1, 1]} : vector<8x512xf32> to vector<8x128xf32>
    %65 = math.tanh %64 : vector<8x128xf32>
    %66 = vector.extract_strided_slice %51 {offsets = [0, 384], sizes = [8, 128], strides = [1, 1]} : vector<8x512xf32> to vector<8x128xf32>
    %67 = arith.negf %66 : vector<8x128xf32>
    %68 = math.exp %67 : vector<8x128xf32>
    %cst_22 = arith.constant 1.000000e+00 : f32
    %69 = vector.broadcast %cst_22 : f32 to vector<8x128xf32>
    %70 = arith.addf %69, %68 : vector<8x128xf32>
    %71 = arith.divf %69, %70 : vector<8x128xf32>
    %72 = arith.mulf %63, %36 : vector<8x128xf32>
    %73 = arith.mulf %57, %65 : vector<8x128xf32>
    %74 = arith.addf %72, %73 : vector<8x128xf32>
    %75 = math.tanh %74 : vector<8x128xf32>
    %76 = arith.mulf %71, %75 : vector<8x128xf32>
    %77 = arith.truncf %76 : vector<8x128xf32> to vector<8x128xbf16>
    %cst_23 = arith.constant dense<0.000000e+00> : vector<8x128xf32>
    %78 = tpu.matmul %77, %4, %cst_23 {dimension_numbers = #tpu.dot_dimension_numbers<[1], [0], [0], [1], [0, 0, 1, 1], [], []>} : vector<8x128xbf16>, vector<128x128xbf16>, vector<8x128xf32> -> vector<8x128xf32>
    %79 = arith.index_cast %c1_i32 : i32 to index
    %c0_24 = arith.constant 0 : index
    %c0_25 = arith.constant 0 : index
    %80 = vector.load %arg12[%79, %c0_24, %c0_25] : memref<8x8x128xf32, #tpu.memory_space<vmem>>, vector<1x8x128xf32>
    %81 = vector.shape_cast %80 : vector<1x8x128xf32> to vector<8x128xf32>
    %82 = vector.shape_cast %78 : vector<8x128xf32> to vector<1x8x128xf32>
    tpu.vector_store %arg12[%79, %c0_24, %c0_25], %82 {strides = array<i32>} : memref<8x8x128xf32, #tpu.memory_space<vmem>>, vector<1x8x128xf32>,
    %c2_i32 = arith.constant 2 : i32
    %83 = arith.index_cast %c2_i32 : i32 to index
    %c0_26 = arith.constant 0 : index
    %c0_27 = arith.constant 0 : index
    %84 = vector.load %arg2[%83, %c0_26, %c0_27] : memref<8x8x512xbf16, #tpu.memory_space<vmem>>, vector<1x8x512xbf16>
    %85 = vector.shape_cast %84 : vector<1x8x512xbf16> to vector<8x512xbf16>
    %86 = arith.extf %85 : vector<8x512xbf16> to vector<8x512xf32>
    %87 = arith.truncf %78 : vector<8x128xf32> to vector<8x128xbf16>
    %cst_28 = arith.constant dense<0.000000e+00> : vector<8x512xf32>
    %88 = tpu.matmul %87, %3, %cst_28 {dimension_numbers = #tpu.dot_dimension_numbers<[1], [0], [0], [1], [0, 0, 1, 1], [], []>} : vector<8x128xbf16>, vector<128x512xbf16>, vector<8x512xf32> -> vector<8x512xf32>
    %89 = arith.addf %86, %88 : vector<8x512xf32>
    %90 = vector.extract_strided_slice %89 {offsets = [0, 0], sizes = [8, 128], strides = [1, 1]} : vector<8x512xf32> to vector<8x128xf32>
    %91 = arith.negf %90 : vector<8x128xf32>
    %92 = math.exp %91 : vector<8x128xf32>
    %cst_29 = arith.constant 1.000000e+00 : f32
    %93 = vector.broadcast %cst_29 : f32 to vector<8x128xf32>
    %94 = arith.addf %93, %92 : vector<8x128xf32>
    %95 = arith.divf %93, %94 : vector<8x128xf32>
    %96 = vector.extract_strided_slice %89 {offsets = [0, 128], sizes = [8, 128], strides = [1, 1]} : vector<8x512xf32> to vector<8x128xf32>
    %97 = arith.negf %96 : vector<8x128xf32>
    %98 = math.exp %97 : vector<8x128xf32>
    %cst_30 = arith.constant 1.000000e+00 : f32
    %99 = vector.broadcast %cst_30 : f32 to vector<8x128xf32>
    %100 = arith.addf %99, %98 : vector<8x128xf32>
    %101 = arith.divf %99, %100 : vector<8x128xf32>
    %102 = vector.extract_strided_slice %89 {offsets = [0, 256], sizes = [8, 128], strides = [1, 1]} : vector<8x512xf32> to vector<8x128xf32>
    %103 = math.tanh %102 : vector<8x128xf32>
    %104 = vector.extract_strided_slice %89 {offsets = [0, 384], sizes = [8, 128], strides = [1, 1]} : vector<8x512xf32> to vector<8x128xf32>
    %105 = arith.negf %104 : vector<8x128xf32>
    %106 = math.exp %105 : vector<8x128xf32>
    %cst_31 = arith.constant 1.000000e+00 : f32
    %107 = vector.broadcast %cst_31 : f32 to vector<8x128xf32>
    %108 = arith.addf %107, %106 : vector<8x128xf32>
    %109 = arith.divf %107, %108 : vector<8x128xf32>
    %110 = arith.mulf %101, %74 : vector<8x128xf32>
    %111 = arith.mulf %95, %103 : vector<8x128xf32>
    %112 = arith.addf %110, %111 : vector<8x128xf32>
    %113 = math.tanh %112 : vector<8x128xf32>
    %114 = arith.mulf %109, %113 : vector<8x128xf32>
    %115 = arith.truncf %114 : vector<8x128xf32> to vector<8x128xbf16>
    %cst_32 = arith.constant dense<0.000000e+00> : vector<8x128xf32>
    %116 = tpu.matmul %115, %4, %cst_32 {dimension_numbers = #tpu.dot_dimension_numbers<[1], [0], [0], [1], [0, 0, 1, 1], [], []>} : vector<8x128xbf16>, vector<128x128xbf16>, vector<8x128xf32> -> vector<8x128xf32>
    %117 = arith.index_cast %c2_i32 : i32 to index
    %c0_33 = arith.constant 0 : index
    %c0_34 = arith.constant 0 : index
    %118 = vector.load %arg12[%117, %c0_33, %c0_34] : memref<8x8x128xf32, #tpu.memory_space<vmem>>, vector<1x8x128xf32>
    %119 = vector.shape_cast %118 : vector<1x8x128xf32> to vector<8x128xf32>
    %120 = vector.shape_cast %116 : vector<8x128xf32> to vector<1x8x128xf32>
    tpu.vector_store %arg12[%117, %c0_33, %c0_34], %120 {strides = array<i32>} : memref<8x8x128xf32, #tpu.memory_space<vmem>>, vector<1x8x128xf32>,
    %c3_i32 = arith.constant 3 : i32
    %121 = arith.index_cast %c3_i32 : i32 to index
    %c0_35 = arith.constant 0 : index
    %c0_36 = arith.constant 0 : index
    %122 = vector.load %arg2[%121, %c0_35, %c0_36] : memref<8x8x512xbf16, #tpu.memory_space<vmem>>, vector<1x8x512xbf16>
    %123 = vector.shape_cast %122 : vector<1x8x512xbf16> to vector<8x512xbf16>
    %124 = arith.extf %123 : vector<8x512xbf16> to vector<8x512xf32>
    %125 = arith.truncf %116 : vector<8x128xf32> to vector<8x128xbf16>
    %cst_37 = arith.constant dense<0.000000e+00> : vector<8x512xf32>
    %126 = tpu.matmul %125, %3, %cst_37 {dimension_numbers = #tpu.dot_dimension_numbers<[1], [0], [0], [1], [0, 0, 1, 1], [], []>} : vector<8x128xbf16>, vector<128x512xbf16>, vector<8x512xf32> -> vector<8x512xf32>
    %127 = arith.addf %124, %126 : vector<8x512xf32>
    %128 = vector.extract_strided_slice %127 {offsets = [0, 0], sizes = [8, 128], strides = [1, 1]} : vector<8x512xf32> to vector<8x128xf32>
    %129 = arith.negf %128 : vector<8x128xf32>
    %130 = math.exp %129 : vector<8x128xf32>
    %cst_38 = arith.constant 1.000000e+00 : f32
    %131 = vector.broadcast %cst_38 : f32 to vector<8x128xf32>
    %132 = arith.addf %131, %130 : vector<8x128xf32>
    %133 = arith.divf %131, %132 : vector<8x128xf32>
    %134 = vector.extract_strided_slice %127 {offsets = [0, 128], sizes = [8, 128], strides = [1, 1]} : vector<8x512xf32> to vector<8x128xf32>
    %135 = arith.negf %134 : vector<8x128xf32>
    %136 = math.exp %135 : vector<8x128xf32>
    %cst_39 = arith.constant 1.000000e+00 : f32
    %137 = vector.broadcast %cst_39 : f32 to vector<8x128xf32>
    %138 = arith.addf %137, %136 : vector<8x128xf32>
    %139 = arith.divf %137, %138 : vector<8x128xf32>
    %140 = vector.extract_strided_slice %127 {offsets = [0, 256], sizes = [8, 128], strides = [1, 1]} : vector<8x512xf32> to vector<8x128xf32>
    %141 = math.tanh %140 : vector<8x128xf32>
    %142 = vector.extract_strided_slice %127 {offsets = [0, 384], sizes = [8, 128], strides = [1, 1]} : vector<8x512xf32> to vector<8x128xf32>
    %143 = arith.negf %142 : vector<8x128xf32>
    %144 = math.exp %143 : vector<8x128xf32>
    %cst_40 = arith.constant 1.000000e+00 : f32
    %145 = vector.broadcast %cst_40 : f32 to vector<8x128xf32>
    %146 = arith.addf %145, %144 : vector<8x128xf32>
    %147 = arith.divf %145, %146 : vector<8x128xf32>
    %148 = arith.mulf %139, %112 : vector<8x128xf32>
    %149 = arith.mulf %133, %141 : vector<8x128xf32>
    %150 = arith.addf %148, %149 : vector<8x128xf32>
    %151 = math.tanh %150 : vector<8x128xf32>
    %152 = arith.mulf %147, %151 : vector<8x128xf32>
    %153 = arith.truncf %152 : vector<8x128xf32> to vector<8x128xbf16>
    %cst_41 = arith.constant dense<0.000000e+00> : vector<8x128xf32>
    %154 = tpu.matmul %153, %4, %cst_41 {dimension_numbers = #tpu.dot_dimension_numbers<[1], [0], [0], [1], [0, 0, 1, 1], [], []>} : vector<8x128xbf16>, vector<128x128xbf16>, vector<8x128xf32> -> vector<8x128xf32>
    %155 = arith.index_cast %c3_i32 : i32 to index
    %c0_42 = arith.constant 0 : index
    %c0_43 = arith.constant 0 : index
    %156 = vector.load %arg12[%155, %c0_42, %c0_43] : memref<8x8x128xf32, #tpu.memory_space<vmem>>, vector<1x8x128xf32>
    %157 = vector.shape_cast %156 : vector<1x8x128xf32> to vector<8x128xf32>
    %158 = vector.shape_cast %154 : vector<8x128xf32> to vector<1x8x128xf32>
    tpu.vector_store %arg12[%155, %c0_42, %c0_43], %158 {strides = array<i32>} : memref<8x8x128xf32, #tpu.memory_space<vmem>>, vector<1x8x128xf32>,
    %c4_i32 = arith.constant 4 : i32
    %159 = arith.index_cast %c4_i32 : i32 to index
    %c0_44 = arith.constant 0 : index
    %c0_45 = arith.constant 0 : index
    %160 = vector.load %arg2[%159, %c0_44, %c0_45] : memref<8x8x512xbf16, #tpu.memory_space<vmem>>, vector<1x8x512xbf16>
    %161 = vector.shape_cast %160 : vector<1x8x512xbf16> to vector<8x512xbf16>
    %162 = arith.extf %161 : vector<8x512xbf16> to vector<8x512xf32>
    %163 = arith.truncf %154 : vector<8x128xf32> to vector<8x128xbf16>
    %cst_46 = arith.constant dense<0.000000e+00> : vector<8x512xf32>
    %164 = tpu.matmul %163, %3, %cst_46 {dimension_numbers = #tpu.dot_dimension_numbers<[1], [0], [0], [1], [0, 0, 1, 1], [], []>} : vector<8x128xbf16>, vector<128x512xbf16>, vector<8x512xf32> -> vector<8x512xf32>
    %165 = arith.addf %162, %164 : vector<8x512xf32>
    %166 = vector.extract_strided_slice %165 {offsets = [0, 0], sizes = [8, 128], strides = [1, 1]} : vector<8x512xf32> to vector<8x128xf32>
    %167 = arith.negf %166 : vector<8x128xf32>
    %168 = math.exp %167 : vector<8x128xf32>
    %cst_47 = arith.constant 1.000000e+00 : f32
    %169 = vector.broadcast %cst_47 : f32 to vector<8x128xf32>
    %170 = arith.addf %169, %168 : vector<8x128xf32>
    %171 = arith.divf %169, %170 : vector<8x128xf32>
    %172 = vector.extract_strided_slice %165 {offsets = [0, 128], sizes = [8, 128], strides = [1, 1]} : vector<8x512xf32> to vector<8x128xf32>
    %173 = arith.negf %172 : vector<8x128xf32>
    %174 = math.exp %173 : vector<8x128xf32>
    %cst_48 = arith.constant 1.000000e+00 : f32
    %175 = vector.broadcast %cst_48 : f32 to vector<8x128xf32>
    %176 = arith.addf %175, %174 : vector<8x128xf32>
    %177 = arith.divf %175, %176 : vector<8x128xf32>
    %178 = vector.extract_strided_slice %165 {offsets = [0, 256], sizes = [8, 128], strides = [1, 1]} : vector<8x512xf32> to vector<8x128xf32>
    %179 = math.tanh %178 : vector<8x128xf32>
    %180 = vector.extract_strided_slice %165 {offsets = [0, 384], sizes = [8, 128], strides = [1, 1]} : vector<8x512xf32> to vector<8x128xf32>
    %181 = arith.negf %180 : vector<8x128xf32>
    %182 = math.exp %181 : vector<8x128xf32>
    %cst_49 = arith.constant 1.000000e+00 : f32
    %183 = vector.broadcast %cst_49 : f32 to vector<8x128xf32>
    %184 = arith.addf %183, %182 : vector<8x128xf32>
    %185 = arith.divf %183, %184 : vector<8x128xf32>
    %186 = arith.mulf %177, %150 : vector<8x128xf32>
    %187 = arith.mulf %171, %179 : vector<8x128xf32>
    %188 = arith.addf %186, %187 : vector<8x128xf32>
    %189 = math.tanh %188 : vector<8x128xf32>
    %190 = arith.mulf %185, %189 : vector<8x128xf32>
    %191 = arith.truncf %190 : vector<8x128xf32> to vector<8x128xbf16>
    %cst_50 = arith.constant dense<0.000000e+00> : vector<8x128xf32>
    %192 = tpu.matmul %191, %4, %cst_50 {dimension_numbers = #tpu.dot_dimension_numbers<[1], [0], [0], [1], [0, 0, 1, 1], [], []>} : vector<8x128xbf16>, vector<128x128xbf16>, vector<8x128xf32> -> vector<8x128xf32>
    %193 = arith.index_cast %c4_i32 : i32 to index
    %c0_51 = arith.constant 0 : index
    %c0_52 = arith.constant 0 : index
    %194 = vector.load %arg12[%193, %c0_51, %c0_52] : memref<8x8x128xf32, #tpu.memory_space<vmem>>, vector<1x8x128xf32>
    %195 = vector.shape_cast %194 : vector<1x8x128xf32> to vector<8x128xf32>
    %196 = vector.shape_cast %192 : vector<8x128xf32> to vector<1x8x128xf32>
    tpu.vector_store %arg12[%193, %c0_51, %c0_52], %196 {strides = array<i32>} : memref<8x8x128xf32, #tpu.memory_space<vmem>>, vector<1x8x128xf32>,
    %c5_i32 = arith.constant 5 : i32
    %197 = arith.index_cast %c5_i32 : i32 to index
    %c0_53 = arith.constant 0 : index
    %c0_54 = arith.constant 0 : index
    %198 = vector.load %arg2[%197, %c0_53, %c0_54] : memref<8x8x512xbf16, #tpu.memory_space<vmem>>, vector<1x8x512xbf16>
    %199 = vector.shape_cast %198 : vector<1x8x512xbf16> to vector<8x512xbf16>
    %200 = arith.extf %199 : vector<8x512xbf16> to vector<8x512xf32>
    %201 = arith.truncf %192 : vector<8x128xf32> to vector<8x128xbf16>
    %cst_55 = arith.constant dense<0.000000e+00> : vector<8x512xf32>
    %202 = tpu.matmul %201, %3, %cst_55 {dimension_numbers = #tpu.dot_dimension_numbers<[1], [0], [0], [1], [0, 0, 1, 1], [], []>} : vector<8x128xbf16>, vector<128x512xbf16>, vector<8x512xf32> -> vector<8x512xf32>
    %203 = arith.addf %200, %202 : vector<8x512xf32>
    %204 = vector.extract_strided_slice %203 {offsets = [0, 0], sizes = [8, 128], strides = [1, 1]} : vector<8x512xf32> to vector<8x128xf32>
    %205 = arith.negf %204 : vector<8x128xf32>
    %206 = math.exp %205 : vector<8x128xf32>
    %cst_56 = arith.constant 1.000000e+00 : f32
    %207 = vector.broadcast %cst_56 : f32 to vector<8x128xf32>
    %208 = arith.addf %207, %206 : vector<8x128xf32>
    %209 = arith.divf %207, %208 : vector<8x128xf32>
    %210 = vector.extract_strided_slice %203 {offsets = [0, 128], sizes = [8, 128], strides = [1, 1]} : vector<8x512xf32> to vector<8x128xf32>
    %211 = arith.negf %210 : vector<8x128xf32>
    %212 = math.exp %211 : vector<8x128xf32>
    %cst_57 = arith.constant 1.000000e+00 : f32
    %213 = vector.broadcast %cst_57 : f32 to vector<8x128xf32>
    %214 = arith.addf %213, %212 : vector<8x128xf32>
    %215 = arith.divf %213, %214 : vector<8x128xf32>
    %216 = vector.extract_strided_slice %203 {offsets = [0, 256], sizes = [8, 128], strides = [1, 1]} : vector<8x512xf32> to vector<8x128xf32>
    %217 = math.tanh %216 : vector<8x128xf32>
    %218 = vector.extract_strided_slice %203 {offsets = [0, 384], sizes = [8, 128], strides = [1, 1]} : vector<8x512xf32> to vector<8x128xf32>
    %219 = arith.negf %218 : vector<8x128xf32>
    %220 = math.exp %219 : vector<8x128xf32>
    %cst_58 = arith.constant 1.000000e+00 : f32
    %221 = vector.broadcast %cst_58 : f32 to vector<8x128xf32>
    %222 = arith.addf %221, %220 : vector<8x128xf32>
    %223 = arith.divf %221, %222 : vector<8x128xf32>
    %224 = arith.mulf %215, %188 : vector<8x128xf32>
    %225 = arith.mulf %209, %217 : vector<8x128xf32>
    %226 = arith.addf %224, %225 : vector<8x128xf32>
    %227 = math.tanh %226 : vector<8x128xf32>
    %228 = arith.mulf %223, %227 : vector<8x128xf32>
    %229 = arith.truncf %228 : vector<8x128xf32> to vector<8x128xbf16>
    %cst_59 = arith.constant dense<0.000000e+00> : vector<8x128xf32>
    %230 = tpu.matmul %229, %4, %cst_59 {dimension_numbers = #tpu.dot_dimension_numbers<[1], [0], [0], [1], [0, 0, 1, 1], [], []>} : vector<8x128xbf16>, vector<128x128xbf16>, vector<8x128xf32> -> vector<8x128xf32>
    %231 = arith.index_cast %c5_i32 : i32 to index
    %c0_60 = arith.constant 0 : index
    %c0_61 = arith.constant 0 : index
    %232 = vector.load %arg12[%231, %c0_60, %c0_61] : memref<8x8x128xf32, #tpu.memory_space<vmem>>, vector<1x8x128xf32>
    %233 = vector.shape_cast %232 : vector<1x8x128xf32> to vector<8x128xf32>
    %234 = vector.shape_cast %230 : vector<8x128xf32> to vector<1x8x128xf32>
    tpu.vector_store %arg12[%231, %c0_60, %c0_61], %234 {strides = array<i32>} : memref<8x8x128xf32, #tpu.memory_space<vmem>>, vector<1x8x128xf32>,
    %c6_i32 = arith.constant 6 : i32
    %235 = arith.index_cast %c6_i32 : i32 to index
    %c0_62 = arith.constant 0 : index
    %c0_63 = arith.constant 0 : index
    %236 = vector.load %arg2[%235, %c0_62, %c0_63] : memref<8x8x512xbf16, #tpu.memory_space<vmem>>, vector<1x8x512xbf16>
    %237 = vector.shape_cast %236 : vector<1x8x512xbf16> to vector<8x512xbf16>
    %238 = arith.extf %237 : vector<8x512xbf16> to vector<8x512xf32>
    %239 = arith.truncf %230 : vector<8x128xf32> to vector<8x128xbf16>
    %cst_64 = arith.constant dense<0.000000e+00> : vector<8x512xf32>
    %240 = tpu.matmul %239, %3, %cst_64 {dimension_numbers = #tpu.dot_dimension_numbers<[1], [0], [0], [1], [0, 0, 1, 1], [], []>} : vector<8x128xbf16>, vector<128x512xbf16>, vector<8x512xf32> -> vector<8x512xf32>
    %241 = arith.addf %238, %240 : vector<8x512xf32>
    %242 = vector.extract_strided_slice %241 {offsets = [0, 0], sizes = [8, 128], strides = [1, 1]} : vector<8x512xf32> to vector<8x128xf32>
    %243 = arith.negf %242 : vector<8x128xf32>
    %244 = math.exp %243 : vector<8x128xf32>
    %cst_65 = arith.constant 1.000000e+00 : f32
    %245 = vector.broadcast %cst_65 : f32 to vector<8x128xf32>
    %246 = arith.addf %245, %244 : vector<8x128xf32>
    %247 = arith.divf %245, %246 : vector<8x128xf32>
    %248 = vector.extract_strided_slice %241 {offsets = [0, 128], sizes = [8, 128], strides = [1, 1]} : vector<8x512xf32> to vector<8x128xf32>
    %249 = arith.negf %248 : vector<8x128xf32>
    %250 = math.exp %249 : vector<8x128xf32>
    %cst_66 = arith.constant 1.000000e+00 : f32
    %251 = vector.broadcast %cst_66 : f32 to vector<8x128xf32>
    %252 = arith.addf %251, %250 : vector<8x128xf32>
    %253 = arith.divf %251, %252 : vector<8x128xf32>
    %254 = vector.extract_strided_slice %241 {offsets = [0, 256], sizes = [8, 128], strides = [1, 1]} : vector<8x512xf32> to vector<8x128xf32>
    %255 = math.tanh %254 : vector<8x128xf32>
    %256 = vector.extract_strided_slice %241 {offsets = [0, 384], sizes = [8, 128], strides = [1, 1]} : vector<8x512xf32> to vector<8x128xf32>
    %257 = arith.negf %256 : vector<8x128xf32>
    %258 = math.exp %257 : vector<8x128xf32>
    %cst_67 = arith.constant 1.000000e+00 : f32
    %259 = vector.broadcast %cst_67 : f32 to vector<8x128xf32>
    %260 = arith.addf %259, %258 : vector<8x128xf32>
    %261 = arith.divf %259, %260 : vector<8x128xf32>
    %262 = arith.mulf %253, %226 : vector<8x128xf32>
    %263 = arith.mulf %247, %255 : vector<8x128xf32>
    %264 = arith.addf %262, %263 : vector<8x128xf32>
    %265 = math.tanh %264 : vector<8x128xf32>
    %266 = arith.mulf %261, %265 : vector<8x128xf32>
    %267 = arith.truncf %266 : vector<8x128xf32> to vector<8x128xbf16>
    %cst_68 = arith.constant dense<0.000000e+00> : vector<8x128xf32>
    %268 = tpu.matmul %267, %4, %cst_68 {dimension_numbers = #tpu.dot_dimension_numbers<[1], [0], [0], [1], [0, 0, 1, 1], [], []>} : vector<8x128xbf16>, vector<128x128xbf16>, vector<8x128xf32> -> vector<8x128xf32>
    %269 = arith.index_cast %c6_i32 : i32 to index
    %c0_69 = arith.constant 0 : index
    %c0_70 = arith.constant 0 : index
    %270 = vector.load %arg12[%269, %c0_69, %c0_70] : memref<8x8x128xf32, #tpu.memory_space<vmem>>, vector<1x8x128xf32>
    %271 = vector.shape_cast %270 : vector<1x8x128xf32> to vector<8x128xf32>
    %272 = vector.shape_cast %268 : vector<8x128xf32> to vector<1x8x128xf32>
    tpu.vector_store %arg12[%269, %c0_69, %c0_70], %272 {strides = array<i32>} : memref<8x8x128xf32, #tpu.memory_space<vmem>>, vector<1x8x128xf32>,
    %c7_i32 = arith.constant 7 : i32
    %273 = arith.index_cast %c7_i32 : i32 to index
    %c0_71 = arith.constant 0 : index
    %c0_72 = arith.constant 0 : index
    %274 = vector.load %arg2[%273, %c0_71, %c0_72] : memref<8x8x512xbf16, #tpu.memory_space<vmem>>, vector<1x8x512xbf16>
    %275 = vector.shape_cast %274 : vector<1x8x512xbf16> to vector<8x512xbf16>
    %276 = arith.extf %275 : vector<8x512xbf16> to vector<8x512xf32>
    %277 = arith.truncf %268 : vector<8x128xf32> to vector<8x128xbf16>
    %cst_73 = arith.constant dense<0.000000e+00> : vector<8x512xf32>
    %278 = tpu.matmul %277, %3, %cst_73 {dimension_numbers = #tpu.dot_dimension_numbers<[1], [0], [0], [1], [0, 0, 1, 1], [], []>} : vector<8x128xbf16>, vector<128x512xbf16>, vector<8x512xf32> -> vector<8x512xf32>
    %279 = arith.addf %276, %278 : vector<8x512xf32>
    %280 = vector.extract_strided_slice %279 {offsets = [0, 0], sizes = [8, 128], strides = [1, 1]} : vector<8x512xf32> to vector<8x128xf32>
    %281 = arith.negf %280 : vector<8x128xf32>
    %282 = math.exp %281 : vector<8x128xf32>
    %cst_74 = arith.constant 1.000000e+00 : f32
    %283 = vector.broadcast %cst_74 : f32 to vector<8x128xf32>
    %284 = arith.addf %283, %282 : vector<8x128xf32>
    %285 = arith.divf %283, %284 : vector<8x128xf32>
    %286 = vector.extract_strided_slice %279 {offsets = [0, 128], sizes = [8, 128], strides = [1, 1]} : vector<8x512xf32> to vector<8x128xf32>
    %287 = arith.negf %286 : vector<8x128xf32>
    %288 = math.exp %287 : vector<8x128xf32>
    %cst_75 = arith.constant 1.000000e+00 : f32
    %289 = vector.broadcast %cst_75 : f32 to vector<8x128xf32>
    %290 = arith.addf %289, %288 : vector<8x128xf32>
    %291 = arith.divf %289, %290 : vector<8x128xf32>
    %292 = vector.extract_strided_slice %279 {offsets = [0, 256], sizes = [8, 128], strides = [1, 1]} : vector<8x512xf32> to vector<8x128xf32>
    %293 = math.tanh %292 : vector<8x128xf32>
    %294 = vector.extract_strided_slice %279 {offsets = [0, 384], sizes = [8, 128], strides = [1, 1]} : vector<8x512xf32> to vector<8x128xf32>
    %295 = arith.negf %294 : vector<8x128xf32>
    %296 = math.exp %295 : vector<8x128xf32>
    %cst_76 = arith.constant 1.000000e+00 : f32
    %297 = vector.broadcast %cst_76 : f32 to vector<8x128xf32>
    %298 = arith.addf %297, %296 : vector<8x128xf32>
    %299 = arith.divf %297, %298 : vector<8x128xf32>
    %300 = arith.mulf %291, %264 : vector<8x128xf32>
    %301 = arith.mulf %285, %293 : vector<8x128xf32>
    %302 = arith.addf %300, %301 : vector<8x128xf32>
    %303 = math.tanh %302 : vector<8x128xf32>
    %304 = arith.mulf %299, %303 : vector<8x128xf32>
    %305 = arith.truncf %304 : vector<8x128xf32> to vector<8x128xbf16>
    %cst_77 = arith.constant dense<0.000000e+00> : vector<8x128xf32>
    %306 = tpu.matmul %305, %4, %cst_77 {dimension_numbers = #tpu.dot_dimension_numbers<[1], [0], [0], [1], [0, 0, 1, 1], [], []>} : vector<8x128xbf16>, vector<128x128xbf16>, vector<8x128xf32> -> vector<8x128xf32>
    %307 = arith.index_cast %c7_i32 : i32 to index
    %c0_78 = arith.constant 0 : index
    %c0_79 = arith.constant 0 : index
    %308 = vector.load %arg12[%307, %c0_78, %c0_79] : memref<8x8x128xf32, #tpu.memory_space<vmem>>, vector<1x8x128xf32>
    %309 = vector.shape_cast %308 : vector<1x8x128xf32> to vector<8x128xf32>
    %310 = vector.shape_cast %306 : vector<8x128xf32> to vector<1x8x128xf32>
    tpu.vector_store %arg12[%307, %c0_78, %c0_79], %310 {strides = array<i32>} : memref<8x8x128xf32, #tpu.memory_space<vmem>>, vector<1x8x128xf32>,
    %c8_i32 = arith.constant 8 : i32
    %c0_80 = arith.constant 0 : index
    %c0_81 = arith.constant 0 : index
    %311 = vector.load %arg10[%c0_80, %c0_81] : memref<8x128xf32, #tpu.memory_space<vmem>>, vector<8x128xf32>
    tpu.vector_store %arg10[%c0_80, %c0_81], %306 {strides = array<i32>} : memref<8x128xf32, #tpu.memory_space<vmem>>, vector<8x128xf32>,
    %c0_82 = arith.constant 0 : index
    %c0_83 = arith.constant 0 : index
    %312 = vector.load %arg11[%c0_82, %c0_83] : memref<8x128xf32, #tpu.memory_space<vmem>>, vector<8x128xf32>
    tpu.vector_store %arg11[%c0_82, %c0_83], %302 {strides = array<i32>} : memref<8x128xf32, #tpu.memory_space<vmem>>, vector<8x128xf32>,
    %c0_84 = arith.constant 0 : index
    %c0_85 = arith.constant 0 : index
    %c0_86 = arith.constant 0 : index
    %313 = vector.load %arg12[%c0_84, %c0_85, %c0_86] : memref<8x8x128xf32, #tpu.memory_space<vmem>>, vector<8x8x128xf32>
    %314 = tpu.iota {dimensions = array<i32: 2>} : vector<1x1x128xi32>
    %c8_i32_87 = arith.constant 8 : i32
    %315 = vector.broadcast %c8_i32_87 : i32 to vector<1x1x128xi32>
    %316 = arith.cmpi slt, %314, %315 : vector<1x1x128xi32>
    %cst_88 = arith.constant -1.000000e+30 : f32
    %317 = vector.shape_cast %316 : vector<1x1x128xi1> to vector<1x1x128xi1>
    %318 = vector.broadcast %317 : vector<1x1x128xi1> to vector<8x8x128xi1>
    %319 = vector.broadcast %cst_88 : f32 to vector<8x8x128xf32>
    %320 = arith.select %318, %313, %319 : vector<8x8x128xi1>, vector<8x8x128xf32>
    %cst_89 = arith.constant dense<0xFF800000> : vector<8x8xf32>
    %321 = vector.multi_reduction <maximumf>, %320, %cst_89 [2] : vector<8x8x128xf32> to vector<8x8xf32>
    %322 = vector.shape_cast %321 : vector<8x8xf32> to vector<8x8x1xf32>
    %323 = vector.broadcast %322 : vector<8x8x1xf32> to vector<8x8x128xf32>
    %324 = arith.subf %320, %323 : vector<8x8x128xf32>
    %325 = math.exp %324 : vector<8x8x128xf32>
    %cst_90 = arith.constant dense<0.000000e+00> : vector<8x8xf32>
    %326 = vector.multi_reduction <add>, %325, %cst_90 [2] : vector<8x8x128xf32> to vector<8x8xf32>
    %327 = vector.shape_cast %326 : vector<8x8xf32> to vector<8x8x1xf32>
    %328 = tpu.reciprocal %327 {approx = true} : vector<8x8x1xf32> -> vector<8x8x1xf32>
    %329 = vector.broadcast %328 : vector<8x8x1xf32> to vector<8x8x128xf32>
    %330 = arith.mulf %325, %329 : vector<8x8x128xf32>
    %331 = vector.extract_strided_slice %330 {offsets = [0, 0, 0], sizes = [8, 8, 8], strides = [1, 1, 1]} : vector<8x8x128xf32> to vector<8x8x8xf32>
    %c0_91 = arith.constant 0 : index
    %c0_92 = arith.constant 0 : index
    %c0_93 = arith.constant 0 : index
    %332 = vector.load %arg7[%c0_91, %c0_92, %c0_93] : memref<8x8x8xf32, #tpu.memory_space<vmem>>, vector<8x8x8xf32>
    tpu.vector_store %arg7[%c0_91, %c0_92, %c0_93], %331 {strides = array<i32>} : memref<8x8x8xf32, #tpu.memory_space<vmem>>, vector<8x8x8xf32>,
    %c0_i32_94 = arith.constant 0 : i32
    %333 = arith.cmpi eq, %arg1, %c0_i32_94 : i32
    %334 = arith.extui %333 : i1 to i32
    %c0_i32_95 = arith.constant 0 : i32
    %335 = arith.cmpi ne, %334, %c0_i32_95 : i32
    scf.if %335 {
      %c0_96 = arith.constant 0 : index
      %c0_97 = arith.constant 0 : index
      %336 = vector.load %arg8[%c0_96, %c0_97] : memref<8x128xf32, #tpu.memory_space<vmem>>, vector<8x128xf32>
      tpu.vector_store %arg8[%c0_96, %c0_97], %306 {strides = array<i32>} : memref<8x128xf32, #tpu.memory_space<vmem>>, vector<8x128xf32>,
      %c0_98 = arith.constant 0 : index
      %c0_99 = arith.constant 0 : index
      %337 = vector.load %arg9[%c0_98, %c0_99] : memref<8x128xf32, #tpu.memory_space<vmem>>, vector<8x128xf32>
      tpu.vector_store %arg9[%c0_98, %c0_99], %302 {strides = array<i32>} : memref<8x128xf32, #tpu.memory_space<vmem>>, vector<8x128xf32>,
    } else {
    }
    return
  }
  func.func @transform_0(%arg0: i32, %arg1: i32) -> (i32, i32, i32) {
    %c0_i32 = arith.constant 0 : i32
    %c0_i32_0 = arith.constant 0 : i32
    return %arg1, %arg0, %c0_i32 : i32, i32, i32
  }
  func.func @transform_1(%arg0: i32, %arg1: i32) -> (i32, i32) {
    %c0_i32 = arith.constant 0 : i32
    %c0_i32_0 = arith.constant 0 : i32
    return %arg0, %c0_i32 : i32, i32
  }
  func.func @transform_2(%arg0: i32, %arg1: i32) -> (i32, i32) {
    %c0_i32 = arith.constant 0 : i32
    %c0_i32_0 = arith.constant 0 : i32
    return %arg0, %c0_i32 : i32, i32
  }
  func.func @transform_3(%arg0: i32, %arg1: i32) -> (i32, i32) {
    %c0_i32 = arith.constant 0 : i32
    %c0_i32_0 = arith.constant 0 : i32
    %c0_i32_1 = arith.constant 0 : i32
    return %c0_i32, %c0_i32_0 : i32, i32
  }
  func.func @transform_4(%arg0: i32, %arg1: i32) -> (i32, i32) {
    %c0_i32 = arith.constant 0 : i32
    %c0_i32_0 = arith.constant 0 : i32
    %c0_i32_1 = arith.constant 0 : i32
    return %c0_i32, %c0_i32_0 : i32, i32
  }
  func.func @transform_5(%arg0: i32, %arg1: i32) -> (i32, i32, i32) {
    %c0_i32 = arith.constant 0 : i32
    %c0_i32_0 = arith.constant 0 : i32
    return %arg1, %arg0, %c0_i32 : i32, i32, i32
  }
  func.func @transform_6(%arg0: i32, %arg1: i32) -> (i32, i32) {
    %c0_i32 = arith.constant 0 : i32
    %c0_i32_0 = arith.constant 0 : i32
    return %arg0, %c0_i32 : i32, i32
  }
  func.func @transform_7(%arg0: i32, %arg1: i32) -> (i32, i32) {
    %c0_i32 = arith.constant 0 : i32
    %c0_i32_0 = arith.constant 0 : i32
    return %arg0, %c0_i32 : i32, i32
  }
}

</mosaic_0001>

<bundles_post_ra>
// kernel: tpu_custom_call.1
= control target key start
LH: loop header
LB: loop body
LE: loop exit
PB: predicated region body
PF: predicated region fallthrough
CT: control target
= control target key end

     0   :  { %13 = vsyncpa [#allocation6], 0  ;;  %s3363_s0 = inlined_call_operand.hbm [shape: bf16[8,8,512], index: 0, kind: input, shape index: {}]   ;;  %s3364_s1 = inlined_call_operand.hbm [shape: f32[8,128], index: 1, kind: input, shape index: {}]   ;;  %s3365_s2 = inlined_call_operand.hbm [shape: f32[8,128], index: 2, kind: input, shape index: {}]   ;;  %s3366_s3 = inlined_call_operand.hbm [shape: bf16[128,512], index: 3, kind: input, shape index: {}]   ;;  %s3367_s4 = inlined_call_operand.hbm [shape: bf16[128,128], index: 4, kind: input, shape index: {}]   ;;  %s3368_s5 = inlined_call_operand.hbm [shape: f32[8,8,8], index: 5, kind: output, shape index: {0}]   ;;  %s3369_s6 = inlined_call_operand.hbm [shape: f32[8,128], index: 6, kind: output, shape index: {1}]   ;;  %s3370_s7 = inlined_call_operand.hbm [shape: f32[8,128], index: 7, kind: output, shape index: {2}]  }
   0x1   :  { %14 = vsyncpa [#allocation9], 0 }
   0x2   :  { %15 = vsyncpa [#allocation12], 0 }
   0x3   :  { %16 = vsyncpa [#allocation7], 0 }
   0x4   :  { %17 = vsyncpa [#allocation16], 0  ;;  %s2552_s24 = smov [#allocation8]   ;;  %s2366_s28 = scalar_lea.hbm %s3364_s1, 128 }
   0x5   :  { %s36_s25 = sshll.u32 %s2552_s24, 4  ;;  %p2367_p0 = scmp.ne.s32.totalorder %s3364_s1, %s2366_s28  ;;  %s37_s25 = int_to_ptr.vmem [resolvable:$true] %s36_s25 }
   0x6   :  { %p2370_p1 = scmp.lt.u32.totalorder %s2366_s28, %s3364_s1 }
   0x8   :  { %p2372_p2 = pnand %p2370_p1, %p2367_p0 }
   0xa   :  { %2375 = shalt.err (!%p2372_p2)
}
   0xb   :  { %s2376_s10 = scalar_lea.vmem %s37_s25, 128  ;;  %p2381_p4 = scmp.lt.s32.totalorder %s37_s25, %s37_s25 }
   0xc   :  { %p2377_p3 = scmp.ne.s32.totalorder %s37_s25, %s2376_s10  ;;  %p2382_p5 = scmp.lt.s32.totalorder %s2376_s10, %s2376_s10 }
   0xe   :  { %p2383_p6 = por %p2382_p5, %p2381_p4 }
  0x10   :  { %p2384_p7 = pnand %p2383_p6, %p2377_p3 }
  0x12   :  { %2387 = shalt.err (!%p2384_p7)
}
  0x13   :  { %39 = dma.hbm_to_vmem [thread:$0]  %s3364_s1, 128, %s37_s25, [#allocation9]  }
  0x14   :  { %s2553_s13 = smov [#allocation11]   ;;  %s2554_s15 = smov [#allocation5]  }
  0x15   :  { %s55_s14 = sshll.u32 %s2553_s13, 4  ;;  %s23_s16 = sshll.u32 %s2554_s15, 4  ;;  %s56_s14 = int_to_ptr.vmem [resolvable:$true] %s55_s14  ;;  %s24_s16 = int_to_ptr.vmem [resolvable:$true] %s23_s16 }
  0x16   :  { %s2388_s19 = scalar_lea.hbm %s3366_s3, 4096 }
  0x17   :  { %p2389_p8 = scmp.ne.s32.totalorder %s3366_s3, %s2388_s19  ;;  %p2392_p9 = scmp.lt.u32.totalorder %s2388_s19, %s3366_s3 }
  0x19   :  { %p2394_p10 = pnand %p2392_p9, %p2389_p8 }
  0x1b   :  { %2397 = shalt.err (!%p2394_p10)
}
  0x1c   :  { %s2398_s1 = scalar_lea.vmem %s56_s14, 4096  ;;  %p2403_p12 = scmp.lt.s32.totalorder %s56_s14, %s56_s14 }
  0x1d   :  { %p2399_p11 = scmp.ne.s32.totalorder %s56_s14, %s2398_s1  ;;  %p2404_p13 = scmp.lt.s32.totalorder %s2398_s1, %s2398_s1 }
  0x1f   :  { %p2405_p0 = por %p2404_p13, %p2403_p12 }
  0x21   :  { %p2406_p1 = pnand %p2405_p0, %p2399_p11 }
  0x23   :  { %2409 = shalt.err (!%p2406_p1)
}
  0x24   :  { %s2555_s24 = smov 256   ;;  %s2556_s25 = smov 16  }
  0x25   :  { %61 = dma.hbm_to_vmem [thread:$0]  %s3366_s3, 4096, %s56_s14, [#allocation12], %s2555_s24, %s2555_s24, %s2556_s25  }
  0x26   :  { %s2410_s30 = scalar_lea.hbm %s3363_s0, 2048 }
  0x27   :  { %p2411_p2 = scmp.ne.s32.totalorder %s3363_s0, %s2410_s30  ;;  %p2414_p3 = scmp.lt.u32.totalorder %s2410_s30, %s3363_s0 }
  0x29   :  { %p2416_p4 = pnand %p2414_p3, %p2411_p2 }
  0x2b   :  { %2419 = shalt.err (!%p2416_p4)
}
  0x2c   :  { %s2420_s12 = scalar_lea.vmem %s24_s16, 2048  ;;  %p2425_p6 = scmp.lt.s32.totalorder %s24_s16, %s24_s16 }
  0x2d   :  { %p2421_p5 = scmp.ne.s32.totalorder %s24_s16, %s2420_s12  ;;  %p2426_p7 = scmp.lt.s32.totalorder %s2420_s12, %s2420_s12 }
  0x2f   :  { %p2427_p8 = por %p2426_p7, %p2425_p6 }
  0x31   :  { %p2428_p9 = pnand %p2427_p8, %p2421_p5 }
  0x33   :  { %2431 = shalt.err (!%p2428_p9)
}
  0x34   :  { %29 = dma.hbm_to_vmem [thread:$0]  %s3363_s0, 2048, %s24_s16, [#allocation6], %s2555_s24, %s2555_s24, %s2556_s25  }
  0x35   :  { %s2557_s14 = smov [#allocation10]   ;;  %s2558_s17 = smov [#allocation13]  }
  0x36   :  { %s46_s15 = sshll.u32 %s2557_s14, 4  ;;  %s67_s18 = sshll.u32 %s2558_s17, 4  ;;  %s47_s15 = int_to_ptr.vmem [resolvable:$true] %s46_s15  ;;  %s68_s18 = int_to_ptr.vmem [resolvable:$true] %s67_s18 }
  0x37   :  { %s2432_s21 = scalar_lea.hbm %s3365_s2, 128 }
  0x38   :  { %p2433_p10 = scmp.ne.s32.totalorder %s3365_s2, %s2432_s21  ;;  %p2436_p11 = scmp.lt.u32.totalorder %s2432_s21, %s3365_s2 }
  0x3a   :  { %p2438_p12 = pnand %p2436_p11, %p2433_p10 }
  0x3c   :  { %2441 = shalt.err (!%p2438_p12)
}
  0x3d   :  { %s2442_s0 = scalar_lea.vmem %s47_s15, 128  ;;  %p2447_p0 = scmp.lt.s32.totalorder %s47_s15, %s47_s15 }
  0x3e   :  { %p2443_p13 = scmp.ne.s32.totalorder %s47_s15, %s2442_s0  ;;  %p2448_p1 = scmp.lt.s32.totalorder %s2442_s0, %s2442_s0 }
  0x40   :  { %p2449_p2 = por %p2448_p1, %p2447_p0 }
  0x42   :  { %p2450_p3 = pnand %p2449_p2, %p2443_p13 }
  0x44   :  { %2453 = shalt.err (!%p2450_p3)
}
  0x45   :  { %49 = dma.hbm_to_vmem [thread:$0]  %s3365_s2, 128, %s47_s15, [#allocation9]  }
  0x46   :  { %s2454_s28 = scalar_lea.hbm %s3367_s4, 1024 }
  0x47   :  { %p2455_p4 = scmp.ne.s32.totalorder %s3367_s4, %s2454_s28  ;;  %p2458_p5 = scmp.lt.u32.totalorder %s2454_s28, %s3367_s4 }
  0x49   :  { %p2460_p6 = pnand %p2458_p5, %p2455_p4 }
  0x4b   :  { %2463 = shalt.err (!%p2460_p6)
}
  0x4c   :  { %s2464_s10 = scalar_lea.vmem %s68_s18, 1024  ;;  %p2469_p8 = scmp.lt.s32.totalorder %s68_s18, %s68_s18 }
  0x4d   :  { %p2465_p7 = scmp.ne.s32.totalorder %s68_s18, %s2464_s10  ;;  %p2470_p9 = scmp.lt.s32.totalorder %s2464_s10, %s2464_s10 }
  0x4f   :  { %p2471_p10 = por %p2470_p9, %p2469_p8 }
  0x51   :  { %p2472_p11 = pnand %p2471_p10, %p2465_p7 }
  0x53   :  { %2475 = shalt.err (!%p2472_p11)
}
  0x54   :  { %s2559_s2 = smov 64   ;;  %s2560_s11 = smov 4  }
  0x55   :  { %73 = dma.hbm_to_vmem [thread:$0]  %s3367_s4, 1024, %s68_s18, [#allocation12], %s2559_s2, %s2559_s2, %s2560_s11  }
  0x56   :  { %2542 = dma.done.wait [#allocation6], 2048  }
  0x57   :  { %2543 = vsyncadd [#allocation6], 4294965248 }
  0x58   :  { %2544 = dma.done.wait [#allocation9], 256  }
  0x59   :  { %2545 = vsyncadd [#allocation9], 4294967040 }
  0x5a   :  { %2546 = dma.done.wait [#allocation12], 5120  }
  0x5b   :  { %2547 = vsyncadd [#allocation12], 4294962176  ;;  %v3373_v0 = vmov 0   ;;  %v2671_v1 = vld [vmem:[#allocation11 + $0x4] ss:$16 sps:$4 sm:$0xff]   ;;  %v3371_v36 = vmov 0.0  }
  0x5c   :  { %347 = vmatprep.mubr.bf16.mxu0 %v3373_v0  ;;  %388 = vmatprep.mubr.bf16.mxu1 %v3373_v0  ;;  %v2673_v2 = vld [vmem:[#allocation11] ss:$16 sps:$4 sm:$0xff]   ;;  %v2676_v3 = vld [vmem:[#allocation11 + $0x24] ss:$16 sps:$4 sm:$0xff]   ;;  %v2684_v6 = vld [vmem:[#allocation11 + $0xc] ss:$16 sps:$4 sm:$0xff]  }
  0x5d   :  { %315 = vmatprep.subr.bf16.mxu0 %v2671_v1  ;;  %v2679_v4 = vld [vmem:[#allocation11 + $0x20] ss:$16 sps:$4 sm:$0xff]   ;;  %v2682_v5 = vld [vmem:[#allocation11 + $0x44] ss:$16 sps:$4 sm:$0xff]   ;;  %3385 = vst [vmem:[#allocation23_spill] sm:$0xff] %v2684_v6  ;;  %356 = vmatprep.subr.bf16.mxu1 %v2684_v6  ;;  %v2790_v37 = vld [vmem:[#allocation13 + $0x8] sm:$0xff]  }
  0x5e   :  { %316 = vmatpush1.bf16.msra.mxu0 %v2673_v2  ;;  %v2686_v7 = vld [vmem:[#allocation11 + $0x8] ss:$16 sps:$4 sm:$0xff]   ;;  %v2689_v8 = vld [vmem:[#allocation11 + $0x40] ss:$16 sps:$4 sm:$0xff]   ;;  %v2693_v9 = vld [vmem:[#allocation11 + $0x64] ss:$16 sps:$4 sm:$0xff]  }
  0x5f   :  { %317 = vmatprep.subr.bf16.mxu0 %v2676_v3  ;;  %357 = vmatpush1.bf16.msra.mxu1 %v2686_v7  ;;  %v2696_v10 = vld [vmem:[#allocation11 + $0x2c] ss:$16 sps:$4 sm:$0xff]   ;;  %v2698_v11 = vld [vmem:[#allocation11 + $0x28] ss:$16 sps:$4 sm:$0xff]   ;;  %v2702_v12 = vld [vmem:[#allocation11 + $0x60] ss:$16 sps:$4 sm:$0xff]  }
  0x60   :  { %358 = vmatprep.subr.bf16.mxu1 %v2696_v10  ;;  %v2704_v13 = vld [vmem:[#allocation11 + $0x84] ss:$16 sps:$4 sm:$0xff]   ;;  %v2706_v14 = vld [vmem:[#allocation11 + $0x4c] ss:$16 sps:$4 sm:$0xff]   ;;  %v2710_v15 = vld [vmem:[#allocation11 + $0x48] ss:$16 sps:$4 sm:$0xff]  }
  0x61   :  { %v2713_v16 = vld [vmem:[#allocation11 + $0x6c] ss:$16 sps:$4 sm:$0xff]   ;;  %v2716_v17 = vld [vmem:[#allocation11 + $0x80] ss:$16 sps:$4 sm:$0xff]   ;;  %v2719_v18 = vld [vmem:[#allocation11 + $0xa4] ss:$16 sps:$4 sm:$0xff]  }
  0x62   :  { %318 = vmatpush1.bf16.msra.mxu0 %v2679_v4  ;;  %v2722_v19 = vld [vmem:[#allocation11 + $0x68] ss:$16 sps:$4 sm:$0xff]   ;;  %v2725_v20 = vld [vmem:[#allocation11 + $0x8c] ss:$16 sps:$4 sm:$0xff]   ;;  %v2727_v21 = vld [vmem:[#allocation11 + $0xa0] ss:$16 sps:$4 sm:$0xff]  }
  0x63   :  { %319 = vmatprep.subr.bf16.mxu0 %v2682_v5  ;;  %359 = vmatpush1.bf16.msra.mxu1 %v2698_v11  ;;  %v2730_v22 = vld [vmem:[#allocation11 + $0xc4] ss:$16 sps:$4 sm:$0xff]   ;;  %v2734_v23 = vld [vmem:[#allocation11 + $0x88] ss:$16 sps:$4 sm:$0xff]   ;;  %v2736_v24 = vld [vmem:[#allocation11 + $0xc0] ss:$16 sps:$4 sm:$0xff]  }
  0x64   :  { %360 = vmatprep.subr.bf16.mxu1 %v2706_v14  ;;  %v2739_v25 = vld [vmem:[#allocation11 + $0xac] ss:$16 sps:$4 sm:$0xff]   ;;  %v2741_v26 = vld [vmem:[#allocation11 + $0xe4] ss:$16 sps:$4 sm:$0xff]   ;;  %v2743_v27 = vld [vmem:[#allocation11 + $0xa8] ss:$16 sps:$4 sm:$0xff]  }
  0x65   :  { %v2746_v28 = vld [vmem:[#allocation11 + $0xcc] ss:$16 sps:$4 sm:$0xff]   ;;  %v2752_v29 = vld [vmem:[#allocation11 + $0xe0] ss:$16 sps:$4 sm:$0xff]   ;;  %v2756_v31 = vld [vmem:[#allocation11 + $0xc8] ss:$16 sps:$4 sm:$0xff]  }
  0x66   :  { %320 = vmatpush1.bf16.msra.mxu0 %v2689_v8  ;;  %3386 = vst [vmem:[#allocation24_spill] sm:$0xff] %v2752_v29  ;;  %v94_v30 = vld [vmem:[#allocation8] sm:$0xff]  ;;  %v2759_v32 = vld [vmem:[#allocation11 + $0xec] ss:$16 sps:$4 sm:$0xff]   ;;  %v2763_v34 = vld [vmem:[#allocation11 + $0xe8] ss:$16 sps:$4 sm:$0xff]  }
  0x67   :  { %321 = vmatprep.subr.bf16.mxu0 %v2693_v9  ;;  %361 = vmatpush1.bf16.msra.mxu1 %v2710_v15  ;;  %v154_v33 = vpack.c.bf16 %v94_v30, %v94_v30  ;;  %v2784_v35 = vld [vmem:[#allocation13] sm:$0xff]   ;;  %v2794_v38 = vld [vmem:[#allocation13 + $0x10] sm:$0xff]   ;;  %v2798_v39 = vld [vmem:[#allocation13 + $0x18] sm:$0xff]   ;;  %vm2563_vm0 = vmmov 0   ;;  %vm1737_vm2 = vcmask 64512   ;;  %s2564_s4 = smov [#allocation15]  }
  0x68   :  { %362 = vmatprep.subr.bf16.mxu1 %v2713_v16  ;;  %v2802_v40 = vld [vmem:[#allocation13 + $0x20] sm:$0xff]   ;;  %v2805_v41 = vld [vmem:[#allocation13 + $0x28] sm:$0xff]   ;;  %v2811_v42 = vld [vmem:[#allocation13 + $0x30] sm:$0xff]   ;;  %s1769_s13 = sshll.u32 %s2564_s4, 4  ;;  %s1770_s13 = int_to_ptr.vmem [resolvable:$true] %s1769_s13 }
  0x69   :  { %v2815_v43 = vld [vmem:[#allocation13 + $0x38] sm:$0xff]   ;;  %v148_v44 = vld [vmem:[#allocation5] sm:$0xff]  ;;  %s2476_s14 = scalar_lea.vmem %s1770_s13, 128  ;;  %p2481_p13 = scmp.lt.s32.totalorder %s1770_s13, %s1770_s13 }
  0x6a   :  { %322 = vmatpush1.bf16.msra.mxu0 %v2702_v12  ;;  %v150_v45 = vunpack.c.l.bf16 %v148_v44  ;;  %v151_v46 = vunpack.c.h.bf16 %v148_v44  ;;  %v149_v48 = vld [vmem:[#allocation5 + $0x8] sm:$0xff]  ;;  %p2477_p12 = scmp.ne.s32.totalorder %s1770_s13, %s2476_s14  ;;  %p2482_p0 = scmp.lt.s32.totalorder %s2476_s14, %s2476_s14 }
  0x6b   :  { %323 = vmatprep.subr.bf16.mxu0 %v2704_v13  ;;  %363 = vmatpush1.bf16.msra.mxu1 %v2722_v19  ;;  %v153_v55 = vunpack.c.h.bf16 %v149_v48  ;;  %v152_v61 = vunpack.c.l.bf16 %v149_v48 }
  0x6c   :  { %364 = vmatprep.subr.bf16.mxu1 %v2725_v20  ;;  %p2483_p1 = por %p2482_p0, %p2481_p13 }
  0x6e   :  { %324 = vmatpush1.bf16.msra.mxu0 %v2716_v17  ;;  %p2484_p2 = pnand %p2483_p1, %p2477_p12 }
  0x6f   :  { %325 = vmatprep.subr.bf16.mxu0 %v2719_v18  ;;  %365 = vmatpush1.bf16.msra.mxu1 %v2734_v23 }
  0x70   :  { %366 = vmatprep.subr.bf16.mxu1 %v2739_v25 }
  0x72   :  { %326 = vmatpush1.bf16.msra.mxu0 %v2727_v21 }
  0x73   :  { %327 = vmatprep.subr.bf16.mxu0 %v2730_v22  ;;  %367 = vmatpush1.bf16.msra.mxu1 %v2743_v27 }
  0x74   :  { %368 = vmatprep.subr.bf16.mxu1 %v2746_v28 }
  0x76   :  { %328 = vmatpush1.bf16.msra.mxu0 %v2736_v24 }
  0x77   :  { %329 = vmatprep.subr.bf16.mxu0 %v2741_v26  ;;  %369 = vmatpush1.bf16.msra.mxu1 %v2756_v31 }
  0x78   :  { %370 = vmatprep.subr.bf16.mxu1 %v2759_v32 }
  0x7a   :  { %330 = vmatpush1.bf16.msra.mxu0 %v2752_v29 }
  0x7b   :  { %371 = vmatpush1.bf16.msra.mxu1 %v2763_v34  ;;  %1933 = vmatprep.subr.bf16.mxu0 %v3371_v36 }
  0x7c   :  { %523 = vmatprep.subr.bf16.mxu1 %v2671_v1 }
  0x7d   :  { %348 = vmatmul.mubr.bf16.vlgmr.msra.gmra.mrb[0].mxu0 %v154_v33 }
  0x7e   :  { %389 = vmatmul.mubr.bf16.vlgmr.msra.gmra.mrb[0].mxu1 %v154_v33  ;;  %1934 = vmatpush3.bf16.msra.mxu0 %v2784_v35 }
  0x7f   :  { %524 = vmatpush1.bf16.msra.mxu1 %v2673_v2  ;;  %555 = vmatprep.mubr.bf16.mxu1 %v3373_v0 }
  0x80   :  { %525 = vmatprep.subr.bf16.mxu1 %v2676_v3  ;;  %1935 = vmatprep.subr.bf16.mxu0 %v3371_v36 }
  0x81   :  { %1949 = vmatprep.mubr.msk.bf16.mxu0 %vm2563_vm0, %v3371_v36 }
  0x82   :  { %1936 = vmatpush3.bf16.msra.mxu0 %v2790_v37 }
  0x83   :  { %526 = vmatpush1.bf16.msra.mxu1 %v2679_v4  ;;  %1937 = vmatprep.subr.bf16.mxu0 %v3371_v36 }
  0x84   :  { %527 = vmatprep.subr.bf16.mxu1 %v2682_v5 }
  0x86   :  { %1938 = vmatpush3.bf16.msra.mxu0 %v2794_v38 }
  0x87   :  { %528 = vmatpush1.bf16.msra.mxu1 %v2689_v8  ;;  %1939 = vmatprep.subr.bf16.mxu0 %v3371_v36 }
  0x88   :  { %529 = vmatprep.subr.bf16.mxu1 %v2693_v9 }
  0x8a   :  { %1940 = vmatpush3.bf16.msra.mxu0 %v2798_v39 }
  0x8b   :  { %530 = vmatpush1.bf16.msra.mxu1 %v2702_v12  ;;  %1941 = vmatprep.subr.bf16.mxu0 %v3371_v36 }
  0x8c   :  { %531 = vmatprep.subr.bf16.mxu1 %v2704_v13 }
  0x8e   :  { %1942 = vmatpush3.bf16.msra.mxu0 %v2802_v40 }
  0x8f   :  { %532 = vmatpush1.bf16.msra.mxu1 %v2716_v17  ;;  %1943 = vmatprep.subr.bf16.mxu0 %v3371_v36 }
  0x90   :  { %533 = vmatprep.subr.bf16.mxu1 %v2719_v18 }
  0x92   :  { %1944 = vmatpush3.bf16.msra.mxu0 %v2805_v41 }
  0x93   :  { %534 = vmatpush1.bf16.msra.mxu1 %v2727_v21  ;;  %1945 = vmatprep.subr.bf16.mxu0 %v3371_v36 }
  0x94   :  { %535 = vmatprep.subr.bf16.mxu1 %v2730_v22 }
  0x96   :  { %1946 = vmatpush3.bf16.msra.mxu0 %v2811_v42 }
  0x97   :  { %536 = vmatpush1.bf16.msra.mxu1 %v2736_v24  ;;  %1947 = vmatprep.subr.bf16.mxu0 %v3371_v36 }
  0x98   :  { %537 = vmatprep.subr.bf16.mxu1 %v2741_v26 }
  0x9a   :  { %1948 = vmatpush3.bf16.msra.mxu0 %v2815_v43 }
  0x9b   :  { %538 = vmatpush1.bf16.msra.mxu1 %v2752_v29  ;;  %564 = vmatprep.subr.bf16.mxu0 %v2684_v6 }
  0x9c   :  { %1953 = vmatprep.subr.bf16.mxu1 %v3371_v36 }
 0x150   :  { %v349_v47 = vpop.f32.mrb[0].mxu0 }
 0x151   :  { %v397_v49 = vadd.f32 %v349_v47, %v150_v45  ;;  %v351_v50 = vpop.f32.mrb[1].mxu0  ;;  %v390_v57 = vpop.f32.mrb[0].mxu1 }
 0x152   :  { %v398_v51 = vadd.f32 %v351_v50, %v151_v46  ;;  %v353_v52 = vpop.f32.mrb[2].mxu0  ;;  %v392_v58 = vpop.f32.mrb[1].mxu1  ;;  %v399_v30 = vadd.f32 %v390_v57, %v152_v61  ;;  %v96_v50 = vld [vmem:[#allocation10] sm:$0xff] }
 0x153   :  { %v1829_v53 = vmul.f32 -1.442695, %v397_v49  ;;  %v354_v54 = vpop.f32.mrb[3].mxu0  ;;  %v400_v59 = vadd.f32 %v392_v58, %v153_v55  ;;  %v394_v60 = vpop.f32.mrb[2].mxu1 }
 0x154   :  { %v1830_v56 = vmul.f32 -1.442695, %v398_v51  ;;  %v395_v62 = vpop.f32.mrb[3].mxu1  ;;  %v1652_v60 = vlaneseq }
 0x155   :  { %2166 = vpow2.f32 %v1829_v53  ;;  %v1831_v63 = vmul.f32 -1.442695, %v400_v59 }
 0x156   :  { %2168 = vpow2.f32 %v1830_v56  ;;  %v2840_v61 = vand.u32 127, %v1652_v60 }
 0x157   :  { %2170 = vpow2.f32 %v1831_v63 }
 0x158   :  { %2172 = vtanh.f32 %v399_v30  ;;  %vm1654_vm1 = vcmp.lt.s32.totalorder %v2840_v61, 8 }
 0x15f   :  { %v2167_v33 = vpop.eup %2166 }
 0x160   :  { %v2169_v44 = vpop.eup %2168  ;;  %v404_v45 = vadd.f32 1.0, %v2167_v33 }
 0x161   :  { %v410_v46 = vadd.f32 1.0, %v2169_v44  ;;  %v2171_v47 = vpop.eup %2170 }
 0x162   :  { %2174 = vrcp.f32 %v404_v45  ;;  %v2173_v49 = vpop.eup %2172  ;;  %v417_v52 = vadd.f32 1.0, %v2171_v47 }
 0x163   :  { %2176 = vrcp.f32 %v410_v46  ;;  %v516_v46 = vld [vmem:[#allocation5 + $0x10] sm:$0xff] }
 0x164   :  { %2178 = vrcp.f32 %v417_v52  ;;  %v518_v47 = vunpack.c.l.bf16 %v516_v46 }
 0x16c   :  { %v2175_v51 = vpop.eup %2174 }
 0x16d   :  { %v2177_v53 = vpop.eup %2176  ;;  %v421_v54 = vmul.f32 %v2175_v51, %v2173_v49  ;;  %v519_v49 = vunpack.c.h.bf16 %v516_v46 }
 0x16e   :  { %v420_v55 = vmul.f32 %v2177_v53, %v96_v50  ;;  %v2179_v56 = vpop.eup %2178  ;;  %v517_v53 = vld [vmem:[#allocation5 + $0x18] sm:$0xff] }
 0x170   :  { %v2820_v48 = vadd.f32 %v421_v54, %v420_v55 }
 0x172   :  { %2180 = vtanh.f32 %v2820_v48 }
 0x17c   :  { %v2181_v57 = vpop.eup %2180 }
 0x17d   :  { %v424_v58 = vmul.f32 %v2181_v57, %v2179_v56 }
 0x17f   :  { %v425_v59 = vpack.c.bf16 %v424_v58, %v424_v58 }
 0x181   :  { %1950 = vmatmul.mubr.bf16.vlgmr.msra.gmra.mrb[4].mxu0 %v425_v59 }
 0x182   :  { %565 = vmatpush1.bf16.msra.mxu0 %v2686_v7  ;;  %596 = vmatprep.mubr.bf16.mxu0 %v3373_v0 }
 0x183   :  { %566 = vmatprep.subr.bf16.mxu0 %v2696_v10 }
 0x186   :  { %567 = vmatpush1.bf16.msra.mxu0 %v2698_v11 }
 0x187   :  { %568 = vmatprep.subr.bf16.mxu0 %v2706_v14 }
 0x18a   :  { %569 = vmatpush1.bf16.msra.mxu0 %v2710_v15 }
 0x18b   :  { %570 = vmatprep.subr.bf16.mxu0 %v2713_v16 }
 0x18e   :  { %571 = vmatpush1.bf16.msra.mxu0 %v2722_v19 }
 0x18f   :  { %572 = vmatprep.subr.bf16.mxu0 %v2725_v20 }
 0x192   :  { %573 = vmatpush1.bf16.msra.mxu0 %v2734_v23 }
 0x193   :  { %574 = vmatprep.subr.bf16.mxu0 %v2739_v25 }
 0x196   :  { %575 = vmatpush1.bf16.msra.mxu0 %v2743_v27 }
 0x197   :  { %576 = vmatprep.subr.bf16.mxu0 %v2746_v28 }
 0x19a   :  { %577 = vmatpush1.bf16.msra.mxu0 %v2756_v31 }
 0x19b   :  { %578 = vmatprep.subr.bf16.mxu0 %v2759_v32 }
 0x19e   :  { %579 = vmatpush1.bf16.msra.mxu0 %v2763_v34 }
 0x19f   :  { %684 = vmatprep.subr.bf16.mxu0 %v2671_v1 }
 0x254   :  { %v508_v62 = vpop.f32.mrb[4].mxu0 }
 0x255   :  { %v522_v63 = vpack.c.bf16 %v508_v62, %v508_v62  ;;  %v1951_v30 = vpop.f32.mrb[5].mxu0  ;;  %v2845_v33 = vsel %vm1654_vm1, %v508_v62, -1e+30 }
 0x256   :  { %3387 = vst [vmem:[#allocation25_spill] sm:$0xff] %v2845_v33  ;;  %1665 = vmax.xlane.f32.xlu0 %v2845_v33  ;;  %v511_v44 = vpop.f32.mrb[6].mxu0  ;;  %v521_v30 = vunpack.c.h.bf16 %v517_v53 }
 0x257   :  { %v1952_v45 = vpop.f32.mrb[7].mxu0  ;;  %556 = vmatmul.mubr.bf16.vlgmr.msra.gmra.mrb[4].mxu1 %v522_v63  ;;  %597 = vmatmul.mubr.bf16.vlgmr.msra.gmra.mrb[8].mxu0 %v522_v63 }
 0x258   :  { %1954 = vmatpush3.bf16.msra.mxu1 %v2784_v35  ;;  %1969 = vmatprep.mubr.msk.bf16.mxu1 %vm2563_vm0, %v3371_v36  ;;  %v520_v45 = vunpack.c.l.bf16 %v517_v53 }
 0x259   :  { %1955 = vmatprep.subr.bf16.mxu1 %v3371_v36  ;;  %685 = vmatpush1.bf16.msra.mxu0 %v2673_v2 }
 0x25a   :  { %686 = vmatprep.subr.bf16.mxu0 %v2676_v3  ;;  %716 = vmatprep.mubr.bf16.mxu0 %v3373_v0 }
 0x25c   :  { %1956 = vmatpush3.bf16.msra.mxu1 %v2790_v37 }
 0x25d   :  { %1957 = vmatprep.subr.bf16.mxu1 %v3371_v36  ;;  %687 = vmatpush1.bf16.msra.mxu0 %v2679_v4 }
 0x25e   :  { %688 = vmatprep.subr.bf16.mxu0 %v2682_v5 }
 0x260   :  { %1958 = vmatpush3.bf16.msra.mxu1 %v2794_v38 }
 0x261   :  { %1959 = vmatprep.subr.bf16.mxu1 %v3371_v36  ;;  %689 = vmatpush1.bf16.msra.mxu0 %v2689_v8 }
 0x262   :  { %690 = vmatprep.subr.bf16.mxu0 %v2693_v9 }
 0x264   :  { %1960 = vmatpush3.bf16.msra.mxu1 %v2798_v39 }
 0x265   :  { %1961 = vmatprep.subr.bf16.mxu1 %v3371_v36  ;;  %691 = vmatpush1.bf16.msra.mxu0 %v2702_v12 }
 0x266   :  { %692 = vmatprep.subr.bf16.mxu0 %v2704_v13 }
 0x268   :  { %1962 = vmatpush3.bf16.msra.mxu1 %v2802_v40 }
 0x269   :  { %1963 = vmatprep.subr.bf16.mxu1 %v3371_v36  ;;  %693 = vmatpush1.bf16.msra.mxu0 %v2716_v17 }
 0x26a   :  { %694 = vmatprep.subr.bf16.mxu0 %v2719_v18 }
 0x26c   :  { %1964 = vmatpush3.bf16.msra.mxu1 %v2805_v41 }
 0x26d   :  { %1965 = vmatprep.subr.bf16.mxu1 %v3371_v36  ;;  %695 = vmatpush1.bf16.msra.mxu0 %v2727_v21 }
 0x26e   :  { %696 = vmatprep.subr.bf16.mxu0 %v2730_v22 }
 0x270   :  { %1966 = vmatpush3.bf16.msra.mxu1 %v2811_v42 }
 0x271   :  { %1967 = vmatprep.subr.bf16.mxu1 %v3371_v36  ;;  %697 = vmatpush1.bf16.msra.mxu0 %v2736_v24 }
 0x272   :  { %698 = vmatprep.subr.bf16.mxu0 %v2741_v26 }
 0x274   :  { %1968 = vmatpush3.bf16.msra.mxu1 %v2815_v43 }
 0x275   :  { %725 = vmatprep.subr.bf16.mxu1 %v2684_v6  ;;  %699 = vmatpush1.bf16.msra.mxu0 %v2752_v29 }
 0x276   :  { %1973 = vmatprep.subr.bf16.mxu0 %v3371_v36 }
 0x32a   :  { %v557_v50 = vpop.f32.mrb[4].mxu1  ;;  %v598_v51 = vpop.f32.mrb[8].mxu0 }
 0x32b   :  { %v605_v52 = vadd.f32 %v557_v50, %v518_v47  ;;  %v559_v54 = vpop.f32.mrb[5].mxu1  ;;  %v600_v55 = vpop.f32.mrb[9].mxu0  ;;  %v607_v46 = vadd.f32 %v598_v51, %v520_v45  ;;  %v3390_v45 = vmov 0.0  }
 0x32c   :  { %v606_v56 = vadd.f32 %v559_v54, %v519_v49  ;;  %v561_v57 = vpop.f32.mrb[6].mxu1  ;;  %v602_v58 = vpop.f32.mrb[10].mxu0  ;;  %v608_v44 = vadd.f32 %v600_v55, %v521_v30 }
 0x32d   :  { %v1840_v59 = vmul.f32 -1.442695, %v605_v52  ;;  %v562_v60 = vpop.f32.mrb[7].mxu1  ;;  %v603_v62 = vpop.f32.mrb[11].mxu0 }
 0x32e   :  { %v1841_v63 = vmul.f32 -1.442695, %v606_v56  ;;  %v1842_v36 = vmul.f32 -1.442695, %v608_v44 }
 0x32f   :  { %2182 = vpow2.f32 %v1840_v59 }
 0x330   :  { %2184 = vpow2.f32 %v1841_v63 }
 0x331   :  { %2186 = vpow2.f32 %v1842_v36 }
 0x332   :  { %2188 = vtanh.f32 %v607_v46  ;;  %v677_v46 = vld [vmem:[#allocation5 + $0x20] sm:$0xff] }
 0x339   :  { %v2183_v0 = vpop.eup %2182 }
 0x33a   :  { %v2185_v33 = vpop.eup %2184  ;;  %v612_v47 = vadd.f32 1.0, %v2183_v0 }
 0x33b   :  { %v618_v50 = vadd.f32 1.0, %v2185_v33  ;;  %v2187_v49 = vpop.eup %2186  ;;  %v3388_v33 = vmov 0  }
 0x33c   :  { %2190 = vrcp.f32 %v612_v47  ;;  %v2189_v52 = vpop.eup %2188  ;;  %v625_v58 = vadd.f32 1.0, %v2187_v49  ;;  %v679_v47 = vunpack.c.l.bf16 %v677_v46 }
 0x33d   :  { %2192 = vrcp.f32 %v618_v50  ;;  %v680_v50 = vunpack.c.h.bf16 %v677_v46 }
 0x33e   :  { %2194 = vrcp.f32 %v625_v58 }
 0x346   :  { %v2191_v54 = vpop.eup %2190 }
 0x347   :  { %v2193_v57 = vpop.eup %2192  ;;  %v629_v56 = vmul.f32 %v2191_v54, %v2189_v52 }
 0x348   :  { %v628_v59 = vmul.f32 %v2193_v57, %v2820_v48  ;;  %v2195_v51 = vpop.eup %2194  ;;  %v678_v57 = vld [vmem:[#allocation5 + $0x28] sm:$0xff] }
 0x34a   :  { %v2884_v55 = vadd.f32 %v629_v56, %v628_v59 }
 0x34c   :  { %2196 = vtanh.f32 %v2884_v55 }
 0x356   :  { %v2197_v0 = vpop.eup %2196 }
 0x357   :  { %v632_v36 = vmul.f32 %v2197_v0, %v2195_v51 }
 0x359   :  { %v633_v53 = vpack.c.bf16 %v632_v36, %v632_v36 }
 0x35b   :  { %1970 = vmatmul.mubr.bf16.vlgmr.msra.gmra.mrb[8].mxu1 %v633_v53 }
 0x35c   :  { %726 = vmatpush1.bf16.msra.mxu1 %v2686_v7  ;;  %757 = vmatprep.mubr.bf16.mxu1 %v3388_v33 }
 0x35d   :  { %727 = vmatprep.subr.bf16.mxu1 %v2696_v10 }
 0x360   :  { %728 = vmatpush1.bf16.msra.mxu1 %v2698_v11 }
 0x361   :  { %729 = vmatprep.subr.bf16.mxu1 %v2706_v14 }
 0x364   :  { %730 = vmatpush1.bf16.msra.mxu1 %v2710_v15 }
 0x365   :  { %731 = vmatprep.subr.bf16.mxu1 %v2713_v16 }
 0x368   :  { %732 = vmatpush1.bf16.msra.mxu1 %v2722_v19 }
 0x369   :  { %733 = vmatprep.subr.bf16.mxu1 %v2725_v20 }
 0x36c   :  { %734 = vmatpush1.bf16.msra.mxu1 %v2734_v23 }
 0x36d   :  { %735 = vmatprep.subr.bf16.mxu1 %v2739_v25 }
 0x370   :  { %736 = vmatpush1.bf16.msra.mxu1 %v2743_v27 }
 0x371   :  { %737 = vmatprep.subr.bf16.mxu1 %v2746_v28 }
 0x374   :  { %738 = vmatpush1.bf16.msra.mxu1 %v2756_v31 }
 0x375   :  { %739 = vmatprep.subr.bf16.mxu1 %v2759_v32 }
 0x378   :  { %740 = vmatpush1.bf16.msra.mxu1 %v2763_v34 }
 0x379   :  { %845 = vmatprep.subr.bf16.mxu1 %v2671_v1 }
 0x42e   :  { %v668_v48 = vpop.f32.mrb[8].mxu1 }
 0x42f   :  { %v683_v60 = vpack.c.bf16 %v668_v48, %v668_v48  ;;  %v1971_v62 = vpop.f32.mrb[9].mxu1  ;;  %v2906_v63 = vsel %vm1654_vm1, %v668_v48, -1e+30 }
 0x430   :  { %3389 = vst [vmem:[#allocation26_spill] sm:$0xff] %v2906_v63  ;;  %1667 = vmax.xlane.f32.xlu0 %v2906_v63  ;;  %v671_v30 = vpop.f32.mrb[10].mxu1  ;;  %v682_v62 = vunpack.c.h.bf16 %v678_v57 }
 0x431   :  { %v1972_v44 = vpop.f32.mrb[11].mxu1  ;;  %717 = vmatmul.mubr.bf16.vlgmr.msra.gmra.mrb[12].mxu0 %v683_v60  ;;  %758 = vmatmul.mubr.bf16.vlgmr.msra.gmra.mrb[12].mxu1 %v683_v60 }
 0x432   :  { %1974 = vmatpush3.bf16.msra.mxu0 %v2784_v35  ;;  %1989 = vmatprep.mubr.msk.bf16.mxu0 %vm2563_vm0, %v3390_v45  ;;  %v681_v44 = vunpack.c.l.bf16 %v678_v57 }
 0x433   :  { %1975 = vmatprep.subr.bf16.mxu0 %v3390_v45  ;;  %846 = vmatpush1.bf16.msra.mxu1 %v2673_v2 }
 0x434   :  { %847 = vmatprep.subr.bf16.mxu1 %v2676_v3  ;;  %877 = vmatprep.mubr.bf16.mxu1 %v3388_v33 }
 0x436   :  { %1976 = vmatpush3.bf16.msra.mxu0 %v2790_v37 }
 0x437   :  { %1977 = vmatprep.subr.bf16.mxu0 %v3390_v45  ;;  %848 = vmatpush1.bf16.msra.mxu1 %v2679_v4 }
 0x438   :  { %849 = vmatprep.subr.bf16.mxu1 %v2682_v5 }
 0x43a   :  { %1978 = vmatpush3.bf16.msra.mxu0 %v2794_v38 }
 0x43b   :  { %1979 = vmatprep.subr.bf16.mxu0 %v3390_v45  ;;  %850 = vmatpush1.bf16.msra.mxu1 %v2689_v8 }
 0x43c   :  { %851 = vmatprep.subr.bf16.mxu1 %v2693_v9 }
 0x43e   :  { %1980 = vmatpush3.bf16.msra.mxu0 %v2798_v39 }
 0x43f   :  { %1981 = vmatprep.subr.bf16.mxu0 %v3390_v45  ;;  %852 = vmatpush1.bf16.msra.mxu1 %v2702_v12 }
 0x440   :  { %853 = vmatprep.subr.bf16.mxu1 %v2704_v13 }
 0x442   :  { %1982 = vmatpush3.bf16.msra.mxu0 %v2802_v40 }
 0x443   :  { %1983 = vmatprep.subr.bf16.mxu0 %v3390_v45  ;;  %854 = vmatpush1.bf16.msra.mxu1 %v2716_v17 }
 0x444   :  { %855 = vmatprep.subr.bf16.mxu1 %v2719_v18 }
 0x446   :  { %1984 = vmatpush3.bf16.msra.mxu0 %v2805_v41 }
 0x447   :  { %1985 = vmatprep.subr.bf16.mxu0 %v3390_v45  ;;  %856 = vmatpush1.bf16.msra.mxu1 %v2727_v21 }
 0x448   :  { %857 = vmatprep.subr.bf16.mxu1 %v2730_v22 }
 0x44a   :  { %1986 = vmatpush3.bf16.msra.mxu0 %v2811_v42 }
 0x44b   :  { %1987 = vmatprep.subr.bf16.mxu0 %v3390_v45  ;;  %858 = vmatpush1.bf16.msra.mxu1 %v2736_v24 }
 0x44c   :  { %859 = vmatprep.subr.bf16.mxu1 %v2741_v26 }
 0x44e   :  { %1988 = vmatpush3.bf16.msra.mxu0 %v2815_v43 }
 0x44f   :  { %886 = vmatprep.subr.bf16.mxu0 %v2684_v6  ;;  %860 = vmatpush1.bf16.msra.mxu1 %v2752_v29 }
 0x450   :  { %1993 = vmatprep.subr.bf16.mxu1 %v3390_v45 }
 0x504   :  { %v718_v49 = vpop.f32.mrb[12].mxu0  ;;  %v759_v52 = vpop.f32.mrb[12].mxu1 }
 0x505   :  { %v766_v54 = vadd.f32 %v718_v49, %v679_v47  ;;  %v720_v56 = vpop.f32.mrb[13].mxu0  ;;  %v761_v58 = vpop.f32.mrb[13].mxu1  ;;  %v768_v46 = vadd.f32 %v759_v52, %v681_v44 }
 0x506   :  { %v767_v59 = vadd.f32 %v720_v56, %v680_v50  ;;  %v722_v51 = vpop.f32.mrb[14].mxu0  ;;  %v763_v0 = vpop.f32.mrb[14].mxu1  ;;  %v769_v30 = vadd.f32 %v761_v58, %v682_v62 }
 0x507   :  { %v1843_v36 = vmul.f32 -1.442695, %v766_v54  ;;  %v723_v53 = vpop.f32.mrb[15].mxu0  ;;  %v764_v48 = vpop.f32.mrb[15].mxu1 }
 0x508   :  { %v1844_v60 = vmul.f32 -1.442695, %v767_v59  ;;  %v1845_v63 = vmul.f32 -1.442695, %v769_v30 }
 0x509   :  { %2198 = vpow2.f32 %v1843_v36 }
 0x50a   :  { %2200 = vpow2.f32 %v1844_v60 }
 0x50b   :  { %2202 = vpow2.f32 %v1845_v63 }
 0x50c   :  { %2204 = vtanh.f32 %v768_v46 }
 0x513   :  { %v2199_v29 = vpop.eup %2198 }
 0x514   :  { %v2201_v6 = vpop.eup %2200  ;;  %v773_v47 = vadd.f32 1.0, %v2199_v29 }
 0x515   :  { %v779_v49 = vadd.f32 1.0, %v2201_v6  ;;  %v2203_v50 = vpop.eup %2202 }
 0x516   :  { %2206 = vrcp.f32 %v773_v47  ;;  %v2205_v54 = vpop.eup %2204  ;;  %v786_v0 = vadd.f32 1.0, %v2203_v50 }
 0x517   :  { %2208 = vrcp.f32 %v779_v49 }
 0x518   :  { %2210 = vrcp.f32 %v786_v0 }
 0x520   :  { %v2207_v56 = vpop.eup %2206 }
 0x521   :  { %v2209_v51 = vpop.eup %2208  ;;  %v790_v59 = vmul.f32 %v2207_v56, %v2205_v54 }
 0x522   :  { %v789_v36 = vmul.f32 %v2209_v51, %v2884_v55  ;;  %v2211_v52 = vpop.eup %2210 }
 0x524   :  { %v2945_v58 = vadd.f32 %v790_v59, %v789_v36 }
 0x526   :  { %2212 = vtanh.f32 %v2945_v58 }
 0x530   :  { %v2213_v29 = vpop.eup %2212 }
 0x531   :  { %v793_v63 = vmul.f32 %v2213_v29, %v2211_v52 }
 0x533   :  { %v794_v57 = vpack.c.bf16 %v793_v63, %v793_v63 }
 0x535   :  { %1990 = vmatmul.mubr.bf16.vlgmr.msra.gmra.mrb[16].mxu0 %v794_v57 }
 0x536   :  { %887 = vmatpush1.bf16.msra.mxu0 %v2686_v7  ;;  %918 = vmatprep.mubr.bf16.mxu0 %v3388_v33 }
 0x537   :  { %888 = vmatprep.subr.bf16.mxu0 %v2696_v10 }
 0x53a   :  { %889 = vmatpush1.bf16.msra.mxu0 %v2698_v11 }
 0x53b   :  { %890 = vmatprep.subr.bf16.mxu0 %v2706_v14 }
 0x53e   :  { %891 = vmatpush1.bf16.msra.mxu0 %v2710_v15 }
 0x53f   :  { %892 = vmatprep.subr.bf16.mxu0 %v2713_v16 }
 0x542   :  { %893 = vmatpush1.bf16.msra.mxu0 %v2722_v19 }
 0x543   :  { %894 = vmatprep.subr.bf16.mxu0 %v2725_v20 }
 0x546   :  { %895 = vmatpush1.bf16.msra.mxu0 %v2734_v23 }
 0x547   :  { %896 = vmatprep.subr.bf16.mxu0 %v2739_v25 }
 0x54a   :  { %897 = vmatpush1.bf16.msra.mxu0 %v2743_v27 }
 0x54b   :  { %898 = vmatprep.subr.bf16.mxu0 %v2746_v28 }
 0x54e   :  { %899 = vmatpush1.bf16.msra.mxu0 %v2756_v31 }
 0x54f   :  { %900 = vmatprep.subr.bf16.mxu0 %v2759_v32 }
 0x552   :  { %901 = vmatpush1.bf16.msra.mxu0 %v2763_v34 }
 0x553   :  { %1006 = vmatprep.subr.bf16.mxu0 %v2671_v1  ;;  %v3392_v1 = vld [vmem:[#allocation23_spill] sm:$0xff] }
 0x608   :  { %v829_v6 = vpop.f32.mrb[16].mxu0 }
 0x609   :  { %v844_v55 = vpack.c.bf16 %v829_v6, %v829_v6  ;;  %v1991_v53 = vpop.f32.mrb[17].mxu0  ;;  %v2967_v48 = vsel %vm1654_vm1, %v829_v6, -1e+30 }
 0x60a   :  { %3391 = vst [vmem:[#allocation27_spill] sm:$0xff] %v2967_v48  ;;  %1669 = vmax.xlane.f32.xlu1 %v2967_v48  ;;  %v832_v60 = vpop.f32.mrb[18].mxu0 }
 0x60b   :  { %v1992_v62 = vpop.f32.mrb[19].mxu0  ;;  %878 = vmatmul.mubr.bf16.vlgmr.msra.gmra.mrb[16].mxu1 %v844_v55  ;;  %919 = vmatmul.mubr.bf16.vlgmr.msra.gmra.mrb[20].mxu0 %v844_v55 }
 0x60c   :  { %1994 = vmatpush3.bf16.msra.mxu1 %v2784_v35  ;;  %2009 = vmatprep.mubr.msk.bf16.mxu1 %vm2563_vm0, %v3390_v45 }
 0x60d   :  { %1995 = vmatprep.subr.bf16.mxu1 %v3390_v45  ;;  %1007 = vmatpush1.bf16.msra.mxu0 %v2673_v2  ;;  %v3393_v2 = vld [vmem:[#allocation24_spill] sm:$0xff] }
 0x60e   :  { %1008 = vmatprep.subr.bf16.mxu0 %v2676_v3  ;;  %1038 = vmatprep.mubr.bf16.mxu0 %v3388_v33  ;;  %v838_v3 = vld [vmem:[#allocation5 + $0x30] sm:$0xff] }
 0x610   :  { %1996 = vmatpush3.bf16.msra.mxu1 %v2790_v37 }
 0x611   :  { %1997 = vmatprep.subr.bf16.mxu1 %v3390_v45  ;;  %1009 = vmatpush1.bf16.msra.mxu0 %v2679_v4  ;;  %v840_v4 = vunpack.c.l.bf16 %v838_v3 }
 0x612   :  { %1010 = vmatprep.subr.bf16.mxu0 %v2682_v5  ;;  %v841_v5 = vunpack.c.h.bf16 %v838_v3 }
 0x614   :  { %1998 = vmatpush3.bf16.msra.mxu1 %v2794_v38 }
 0x615   :  { %1999 = vmatprep.subr.bf16.mxu1 %v3390_v45  ;;  %1011 = vmatpush1.bf16.msra.mxu0 %v2689_v8 }
 0x616   :  { %1012 = vmatprep.subr.bf16.mxu0 %v2693_v9 }
 0x618   :  { %2000 = vmatpush3.bf16.msra.mxu1 %v2798_v39 }
 0x619   :  { %2001 = vmatprep.subr.bf16.mxu1 %v3390_v45  ;;  %1013 = vmatpush1.bf16.msra.mxu0 %v2702_v12 }
 0x61a   :  { %1014 = vmatprep.subr.bf16.mxu0 %v2704_v13  ;;  %v839_v13 = vld [vmem:[#allocation5 + $0x38] sm:$0xff] }
 0x61b   :  { %v843_v50 = vunpack.c.h.bf16 %v839_v13  ;;  %v842_v56 = vunpack.c.l.bf16 %v839_v13 }
 0x61c   :  { %2002 = vmatpush3.bf16.msra.mxu1 %v2802_v40 }
 0x61d   :  { %2003 = vmatprep.subr.bf16.mxu1 %v3390_v45  ;;  %1015 = vmatpush1.bf16.msra.mxu0 %v2716_v17 }
 0x61e   :  { %1016 = vmatprep.subr.bf16.mxu0 %v2719_v18 }
 0x620   :  { %2004 = vmatpush3.bf16.msra.mxu1 %v2805_v41 }
 0x621   :  { %2005 = vmatprep.subr.bf16.mxu1 %v3390_v45  ;;  %1017 = vmatpush1.bf16.msra.mxu0 %v2727_v21 }
 0x622   :  { %1018 = vmatprep.subr.bf16.mxu0 %v2730_v22 }
 0x624   :  { %2006 = vmatpush3.bf16.msra.mxu1 %v2811_v42 }
 0x625   :  { %2007 = vmatprep.subr.bf16.mxu1 %v3390_v45  ;;  %1019 = vmatpush1.bf16.msra.mxu0 %v2736_v24 }
 0x626   :  { %1020 = vmatprep.subr.bf16.mxu0 %v2741_v26 }
 0x628   :  { %2008 = vmatpush3.bf16.msra.mxu1 %v2815_v43 }
 0x629   :  { %1047 = vmatprep.subr.bf16.mxu1 %v3392_v1  ;;  %1021 = vmatpush1.bf16.msra.mxu0 %v3393_v2 }
 0x62a   :  { %2013 = vmatprep.subr.bf16.mxu0 %v3390_v45 }
 0x6de   :  { %v879_v8 = vpop.f32.mrb[16].mxu1  ;;  %v920_v9 = vpop.f32.mrb[20].mxu0 }
 0x6df   :  { %v927_v12 = vadd.f32 %v879_v8, %v840_v4  ;;  %v881_v17 = vpop.f32.mrb[17].mxu1  ;;  %v922_v18 = vpop.f32.mrb[21].mxu0  ;;  %v929_v59 = vadd.f32 %v920_v9, %v842_v56 }
 0x6e0   :  { %v928_v21 = vadd.f32 %v881_v17, %v841_v5  ;;  %v883_v22 = vpop.f32.mrb[18].mxu1  ;;  %v924_v30 = vpop.f32.mrb[22].mxu0  ;;  %v930_v54 = vadd.f32 %v922_v18, %v843_v50  ;;  %v1000_v17 = vld [vmem:[#allocation5 + $0x48] sm:$0xff] }
 0x6e1   :  { %v1846_v44 = vmul.f32 -1.442695, %v927_v12  ;;  %v884_v46 = vpop.f32.mrb[19].mxu1  ;;  %v925_v47 = vpop.f32.mrb[23].mxu0 }
 0x6e2   :  { %v1847_v49 = vmul.f32 -1.442695, %v928_v21  ;;  %v1848_v51 = vmul.f32 -1.442695, %v930_v54  ;;  %v1004_v47 = vunpack.c.h.bf16 %v1000_v17 }
 0x6e3   :  { %2214 = vpow2.f32 %v1846_v44 }
 0x6e4   :  { %2216 = vpow2.f32 %v1847_v49  ;;  %v1003_v49 = vunpack.c.l.bf16 %v1000_v17  ;;  %v3141_v17 = vld [vmem:[#allocation11 + $0xe8] ss:$16 sps:$4 sm:$0xff]  }
 0x6e5   :  { %2218 = vpow2.f32 %v1848_v51 }
 0x6e6   :  { %2220 = vtanh.f32 %v929_v59 }
 0x6ed   :  { %v2215_v0 = vpop.eup %2214 }
 0x6ee   :  { %v2217_v36 = vpop.eup %2216  ;;  %v934_v52 = vadd.f32 1.0, %v2215_v0 }
 0x6ef   :  { %v940_v29 = vadd.f32 1.0, %v2217_v36  ;;  %v2219_v63 = vpop.eup %2218 }
 0x6f0   :  { %2222 = vrcp.f32 %v934_v52  ;;  %v2221_v57 = vpop.eup %2220  ;;  %v947_v60 = vadd.f32 1.0, %v2219_v63 }
 0x6f1   :  { %2224 = vrcp.f32 %v940_v29 }
 0x6f2   :  { %2226 = vrcp.f32 %v947_v60 }
 0x6fa   :  { %v2223_v6 = vpop.eup %2222 }
 0x6fb   :  { %v2225_v55 = vpop.eup %2224  ;;  %v951_v53 = vmul.f32 %v2223_v6, %v2221_v57 }
 0x6fc   :  { %v950_v62 = vmul.f32 %v2225_v55, %v2945_v58  ;;  %v2227_v3 = vpop.eup %2226 }
 0x6fe   :  { %v3006_v1 = vadd.f32 %v951_v53, %v950_v62 }
 0x700   :  { %2228 = vtanh.f32 %v3006_v1 }
 0x70a   :  { %v2229_v4 = vpop.eup %2228 }
 0x70b   :  { %v954_v5 = vmul.f32 %v2229_v4, %v2227_v3 }
 0x70d   :  { %v955_v8 = vpack.c.bf16 %v954_v5, %v954_v5  ;;  %v3098_v5 = vld [vmem:[#allocation11 + $0x8] ss:$16 sps:$4 sm:$0xff]  }
 0x70f   :  { %2010 = vmatmul.mubr.bf16.vlgmr.msra.gmra.mrb[20].mxu1 %v955_v8  ;;  %v3102_v8 = vld [vmem:[#allocation11 + $0x2c] ss:$16 sps:$4 sm:$0xff]  }
 0x710   :  { %1048 = vmatpush1.bf16.msra.mxu1 %v2686_v7  ;;  %1079 = vmatprep.mubr.bf16.mxu1 %v3388_v33  ;;  %v3025_v7 = vld [vmem:[#allocation11 + $0x4] ss:$16 sps:$4 sm:$0xff]  }
 0x711   :  { %1049 = vmatprep.subr.bf16.mxu1 %v2696_v10 }
 0x714   :  { %1050 = vmatpush1.bf16.msra.mxu1 %v2698_v11 }
 0x715   :  { %1051 = vmatprep.subr.bf16.mxu1 %v2706_v14 }
 0x718   :  { %1052 = vmatpush1.bf16.msra.mxu1 %v2710_v15 }
 0x719   :  { %1053 = vmatprep.subr.bf16.mxu1 %v2713_v16 }
 0x71c   :  { %1054 = vmatpush1.bf16.msra.mxu1 %v2722_v19 }
 0x71d   :  { %1055 = vmatprep.subr.bf16.mxu1 %v2725_v20  ;;  %v3037_v20 = vld [vmem:[#allocation11] ss:$16 sps:$4 sm:$0xff]  }
 0x720   :  { %1056 = vmatpush1.bf16.msra.mxu1 %v2734_v23  ;;  %v3040_v23 = vld [vmem:[#allocation11 + $0x24] ss:$16 sps:$4 sm:$0xff]  }
 0x721   :  { %1057 = vmatprep.subr.bf16.mxu1 %v2739_v25  ;;  %v3046_v25 = vld [vmem:[#allocation11 + $0x20] ss:$16 sps:$4 sm:$0xff]  }
 0x724   :  { %1058 = vmatpush1.bf16.msra.mxu1 %v2743_v27  ;;  %v3049_v27 = vld [vmem:[#allocation11 + $0x44] ss:$16 sps:$4 sm:$0xff]  }
 0x725   :  { %1059 = vmatprep.subr.bf16.mxu1 %v2746_v28  ;;  %v3054_v28 = vld [vmem:[#allocation11 + $0x40] ss:$16 sps:$4 sm:$0xff]  }
 0x728   :  { %1060 = vmatpush1.bf16.msra.mxu1 %v2756_v31  ;;  %v3057_v31 = vld [vmem:[#allocation11 + $0x64] ss:$16 sps:$4 sm:$0xff]  }
 0x729   :  { %1061 = vmatprep.subr.bf16.mxu1 %v2759_v32  ;;  %v3062_v32 = vld [vmem:[#allocation11 + $0x60] ss:$16 sps:$4 sm:$0xff]  }
 0x72c   :  { %1062 = vmatpush1.bf16.msra.mxu1 %v2763_v34  ;;  %v3065_v34 = vld [vmem:[#allocation11 + $0x84] ss:$16 sps:$4 sm:$0xff]  }
 0x72d   :  { %1167 = vmatprep.subr.bf16.mxu1 %v3025_v7 }
 0x7e2   :  { %v990_v10 = vpop.f32.mrb[20].mxu1 }
 0x7e3   :  { %v1005_v11 = vpack.c.bf16 %v990_v10, %v990_v10  ;;  %v2011_v14 = vpop.f32.mrb[21].mxu1  ;;  %v3030_v15 = vsel %vm1654_vm1, %v990_v10, -1e+30  ;;  %v3108_v10 = vld [vmem:[#allocation11 + $0x4c] ss:$16 sps:$4 sm:$0xff]  }
 0x7e4   :  { %3394 = vst [vmem:[#allocation23_spill] sm:$0xff] %v3030_v15  ;;  %1671 = vmax.xlane.f32.xlu1 %v3030_v15  ;;  %v993_v16 = vpop.f32.mrb[22].mxu1  ;;  %v3114_v14 = vld [vmem:[#allocation11 + $0x6c] ss:$16 sps:$4 sm:$0xff]  }
 0x7e5   :  { %v2012_v19 = vpop.f32.mrb[23].mxu1  ;;  %1039 = vmatmul.mubr.bf16.vlgmr.msra.gmra.mrb[24].mxu0 %v1005_v11  ;;  %1080 = vmatmul.mubr.bf16.vlgmr.msra.gmra.mrb[24].mxu1 %v1005_v11  ;;  %v3111_v11 = vld [vmem:[#allocation11 + $0x48] ss:$16 sps:$4 sm:$0xff]  }
 0x7e6   :  { %2014 = vmatpush3.bf16.msra.mxu0 %v2784_v35  ;;  %2029 = vmatprep.mubr.msk.bf16.mxu0 %vm2563_vm0, %v3390_v45  ;;  %v3070_v35 = vld [vmem:[#allocation11 + $0x80] ss:$16 sps:$4 sm:$0xff]   ;;  %v3117_v16 = vld [vmem:[#allocation11 + $0x68] ss:$16 sps:$4 sm:$0xff]   ;;  %v3120_v19 = vld [vmem:[#allocation11 + $0x8c] ss:$16 sps:$4 sm:$0xff]  }
 0x7e7   :  { %2015 = vmatprep.subr.bf16.mxu0 %v3390_v45  ;;  %1168 = vmatpush1.bf16.msra.mxu1 %v3037_v20 }
 0x7e8   :  { %1169 = vmatprep.subr.bf16.mxu1 %v3040_v23  ;;  %1199 = vmatprep.mubr.bf16.mxu1 %v3388_v33 }
 0x7ea   :  { %2016 = vmatpush3.bf16.msra.mxu0 %v2790_v37  ;;  %v3073_v37 = vld [vmem:[#allocation11 + $0xa4] ss:$16 sps:$4 sm:$0xff]  }
 0x7eb   :  { %2017 = vmatprep.subr.bf16.mxu0 %v3390_v45  ;;  %1170 = vmatpush1.bf16.msra.mxu1 %v3046_v25 }
 0x7ec   :  { %1171 = vmatprep.subr.bf16.mxu1 %v3049_v27 }
 0x7ee   :  { %2018 = vmatpush3.bf16.msra.mxu0 %v2794_v38  ;;  %v3078_v38 = vld [vmem:[#allocation11 + $0xa0] ss:$16 sps:$4 sm:$0xff]  }
 0x7ef   :  { %2019 = vmatprep.subr.bf16.mxu0 %v3390_v45  ;;  %1172 = vmatpush1.bf16.msra.mxu1 %v3054_v28 }
 0x7f0   :  { %1173 = vmatprep.subr.bf16.mxu1 %v3057_v31 }
 0x7f2   :  { %2020 = vmatpush3.bf16.msra.mxu0 %v2798_v39  ;;  %v3081_v39 = vld [vmem:[#allocation11 + $0xc4] ss:$16 sps:$4 sm:$0xff]  }
 0x7f3   :  { %2021 = vmatprep.subr.bf16.mxu0 %v3390_v45  ;;  %1174 = vmatpush1.bf16.msra.mxu1 %v3062_v32 }
 0x7f4   :  { %1175 = vmatprep.subr.bf16.mxu1 %v3065_v34 }
 0x7f6   :  { %2022 = vmatpush3.bf16.msra.mxu0 %v2802_v40  ;;  %v3089_v40 = vld [vmem:[#allocation11 + $0xc] ss:$16 sps:$4 sm:$0xff]  }
 0x7f7   :  { %2023 = vmatprep.subr.bf16.mxu0 %v3390_v45  ;;  %1176 = vmatpush1.bf16.msra.mxu1 %v3070_v35  ;;  %3395 = vst [vmem:[#allocation24_spill] sm:$0xff] %v3089_v40 }
 0x7f8   :  { %1177 = vmatprep.subr.bf16.mxu1 %v3073_v37 }
 0x7fa   :  { %2024 = vmatpush3.bf16.msra.mxu0 %v2805_v41  ;;  %v999_v41 = vld [vmem:[#allocation5 + $0x40] sm:$0xff] }
 0x7fb   :  { %2025 = vmatprep.subr.bf16.mxu0 %v3390_v45  ;;  %1178 = vmatpush1.bf16.msra.mxu1 %v3078_v38  ;;  %v1001_v58 = vunpack.c.l.bf16 %v999_v41  ;;  %v1002_v9 = vunpack.c.h.bf16 %v999_v41  ;;  %v3123_v41 = vld [vmem:[#allocation11 + $0x88] ss:$16 sps:$4 sm:$0xff]  }
 0x7fc   :  { %1179 = vmatprep.subr.bf16.mxu1 %v3081_v39 }
 0x7fe   :  { %2026 = vmatpush3.bf16.msra.mxu0 %v2811_v42 }
 0x7ff   :  { %2027 = vmatprep.subr.bf16.mxu0 %v3390_v45  ;;  %1180 = vmatpush1.bf16.msra.mxu1 %v2736_v24 }
 0x800   :  { %1181 = vmatprep.subr.bf16.mxu1 %v2741_v26 }
 0x802   :  { %2028 = vmatpush3.bf16.msra.mxu0 %v2815_v43 }
 0x803   :  { %1208 = vmatprep.subr.bf16.mxu0 %v3089_v40  ;;  %1182 = vmatpush1.bf16.msra.mxu1 %v3393_v2 }
 0x804   :  { %2033 = vmatprep.subr.bf16.mxu1 %v3390_v45 }
 0x8b8   :  { %v1040_v42 = vpop.f32.mrb[24].mxu0  ;;  %v1081_v12 = vpop.f32.mrb[24].mxu1 }
 0x8b9   :  { %v1088_v13 = vadd.f32 %v1040_v42, %v1001_v58  ;;  %v1042_v24 = vpop.f32.mrb[25].mxu0  ;;  %v1083_v18 = vpop.f32.mrb[25].mxu1  ;;  %v1090_v54 = vadd.f32 %v1081_v12, %v1003_v49  ;;  %v3126_v58 = vld [vmem:[#allocation11 + $0xac] ss:$16 sps:$4 sm:$0xff]   ;;  %v3135_v12 = vld [vmem:[#allocation11 + $0xc8] ss:$16 sps:$4 sm:$0xff]  }
 0x8ba   :  { %v1089_v26 = vadd.f32 %v1042_v24, %v1002_v9  ;;  %v1044_v21 = vpop.f32.mrb[26].mxu0  ;;  %v1085_v43 = vpop.f32.mrb[26].mxu1  ;;  %v1091_v2 = vadd.f32 %v1083_v18, %v1004_v47  ;;  %v3129_v9 = vld [vmem:[#allocation11 + $0xa8] ss:$16 sps:$4 sm:$0xff]   ;;  %v3132_v42 = vld [vmem:[#allocation11 + $0xcc] ss:$16 sps:$4 sm:$0xff]  }
 0x8bb   :  { %v1849_v22 = vmul.f32 -1.442695, %v1088_v13  ;;  %v1045_v30 = vpop.f32.mrb[27].mxu0  ;;  %v1086_v44 = vpop.f32.mrb[27].mxu1  ;;  %v3138_v13 = vld [vmem:[#allocation11 + $0xec] ss:$16 sps:$4 sm:$0xff]  }
 0x8bc   :  { %v1850_v46 = vmul.f32 -1.442695, %v1089_v26  ;;  %v1851_v50 = vmul.f32 -1.442695, %v1091_v2  ;;  %v3150_v30 = vld [vmem:[#allocation13] sm:$0xff]   ;;  %v3159_v44 = vld [vmem:[#allocation13 + $0x8] sm:$0xff]  }
 0x8bd   :  { %2230 = vpow2.f32 %v1849_v22  ;;  %v3171_v47 = vld [vmem:[#allocation13 + $0x18] sm:$0xff]   ;;  %v3177_v2 = vld [vmem:[#allocation13 + $0x20] sm:$0xff]   ;;  %v3183_v49 = vld [vmem:[#allocation13 + $0x28] sm:$0xff]  }
 0x8be   :  { %2232 = vpow2.f32 %v1850_v46  ;;  %v3165_v46 = vld [vmem:[#allocation13 + $0x10] sm:$0xff]  }
 0x8bf   :  { %2234 = vpow2.f32 %v1851_v50  ;;  %v3189_v50 = vld [vmem:[#allocation13 + $0x30] sm:$0xff]  }
 0x8c0   :  { %2236 = vtanh.f32 %v1090_v54  ;;  %v3193_v54 = vld [vmem:[#allocation11 + $0xc0] ss:$16 sps:$4 sm:$0xff]  }
 0x8c7   :  { %v2231_v56 = vpop.eup %2230 }
 0x8c8   :  { %v2233_v51 = vpop.eup %2232  ;;  %v1095_v59 = vadd.f32 1.0, %v2231_v56  ;;  %v3196_v56 = vld [vmem:[#allocation11 + $0xe4] ss:$16 sps:$4 sm:$0xff]  }
 0x8c9   :  { %v1101_v0 = vadd.f32 1.0, %v2233_v51  ;;  %v2235_v36 = vpop.eup %2234  ;;  %v3199_v51 = vld [vmem:[#allocation13 + $0x38] sm:$0xff]  }
 0x8ca   :  { %2238 = vrcp.f32 %v1095_v59  ;;  %v2237_v52 = vpop.eup %2236  ;;  %v1108_v6 = vadd.f32 1.0, %v2235_v36  ;;  %v3203_v59 = vld [vmem:[#allocation11 + $0xe0] ss:$16 sps:$4 sm:$0xff]  }
 0x8cb   :  { %2240 = vrcp.f32 %v1101_v0  ;;  %3397 = vst [vmem:[#allocation29_spill] sm:$0xff] %v3203_v59  ;;  %v1160_v0 = vld [vmem:[#allocation5 + $0x50] sm:$0xff] }
 0x8cc   :  { %2242 = vrcp.f32 %v1108_v6  ;;  %v1162_v36 = vunpack.c.l.bf16 %v1160_v0  ;;  %v1161_v6 = vld [vmem:[#allocation5 + $0x58] sm:$0xff] }
 0x8d4   :  { %v2239_v29 = vpop.eup %2238 }
 0x8d5   :  { %v2241_v63 = vpop.eup %2240  ;;  %v1112_v57 = vmul.f32 %v2239_v29, %v2237_v52  ;;  %v1163_v52 = vunpack.c.h.bf16 %v1160_v0 }
 0x8d6   :  { %v1111_v55 = vmul.f32 %v2241_v63, %v3006_v1  ;;  %v2243_v60 = vpop.eup %2242  ;;  %v3105_v1 = vld [vmem:[#allocation11 + $0x28] ss:$16 sps:$4 sm:$0xff]  }
 0x8d8   :  { %v3095_v53 = vadd.f32 %v1112_v57, %v1111_v55 }
 0x8da   :  { %2244 = vtanh.f32 %v3095_v53 }
 0x8e4   :  { %v2245_v62 = vpop.eup %2244 }
 0x8e5   :  { %v1115_v3 = vmul.f32 %v2245_v62, %v2243_v60 }
 0x8e7   :  { %v1116_v4 = vpack.c.bf16 %v1115_v3, %v1115_v3 }
 0x8e9   :  { %2030 = vmatmul.mubr.bf16.vlgmr.msra.gmra.mrb[28].mxu0 %v1116_v4 }
 0x8ea   :  { %1209 = vmatpush1.bf16.msra.mxu0 %v3098_v5  ;;  %1240 = vmatprep.mubr.bf16.mxu0 %v3388_v33 }
 0x8eb   :  { %1210 = vmatprep.subr.bf16.mxu0 %v3102_v8 }
 0x8ee   :  { %1211 = vmatpush1.bf16.msra.mxu0 %v3105_v1 }
 0x8ef   :  { %1212 = vmatprep.subr.bf16.mxu0 %v3108_v10 }
 0x8f2   :  { %1213 = vmatpush1.bf16.msra.mxu0 %v3111_v11 }
 0x8f3   :  { %1214 = vmatprep.subr.bf16.mxu0 %v3114_v14 }
 0x8f6   :  { %1215 = vmatpush1.bf16.msra.mxu0 %v3117_v16 }
 0x8f7   :  { %1216 = vmatprep.subr.bf16.mxu0 %v3120_v19 }
 0x8fa   :  { %1217 = vmatpush1.bf16.msra.mxu0 %v3123_v41 }
 0x8fb   :  { %1218 = vmatprep.subr.bf16.mxu0 %v3126_v58 }
 0x8fe   :  { %1219 = vmatpush1.bf16.msra.mxu0 %v3129_v9 }
 0x8ff   :  { %1220 = vmatprep.subr.bf16.mxu0 %v3132_v42 }
 0x902   :  { %1221 = vmatpush1.bf16.msra.mxu0 %v3135_v12 }
 0x903   :  { %1222 = vmatprep.subr.bf16.mxu0 %v3138_v13 }
 0x906   :  { %1223 = vmatpush1.bf16.msra.mxu0 %v3141_v17 }
 0x907   :  { %1328 = vmatprep.subr.bf16.mxu0 %v3025_v7 }
 0x9bc   :  { %v1151_v24 = vpop.f32.mrb[28].mxu0 }
 0x9bd   :  { %v1166_v18 = vpack.c.bf16 %v1151_v24, %v1151_v24  ;;  %v2031_v26 = vpop.f32.mrb[29].mxu0  ;;  %v3147_v21 = vsel %vm1654_vm1, %v1151_v24, -1e+30 }
 0x9be   :  { %3396 = vst [vmem:[#allocation28_spill] sm:$0xff] %v3147_v21  ;;  %1673 = vmax.xlane.f32.xlu0 %v3147_v21  ;;  %v1154_v43 = vpop.f32.mrb[30].mxu0  ;;  %v1164_v21 = vunpack.c.l.bf16 %v1161_v6 }
 0x9bf   :  { %v2032_v22 = vpop.f32.mrb[31].mxu0  ;;  %1200 = vmatmul.mubr.bf16.vlgmr.msra.gmra.mrb[28].mxu1 %v1166_v18  ;;  %1241 = vmatmul.mubr.bf16.vlgmr.msra.gmra.mrb[32].mxu0 %v1166_v18 }
 0x9c0   :  { %2034 = vmatpush3.bf16.msra.mxu1 %v3150_v30  ;;  %2049 = vmatprep.mubr.msk.bf16.mxu1 %vm2563_vm0, %v3390_v45  ;;  %v1165_v22 = vunpack.c.h.bf16 %v1161_v6 }
 0x9c1   :  { %2035 = vmatprep.subr.bf16.mxu1 %v3390_v45  ;;  %1329 = vmatpush1.bf16.msra.mxu0 %v3037_v20 }
 0x9c2   :  { %1330 = vmatprep.subr.bf16.mxu0 %v3040_v23  ;;  %1360 = vmatprep.mubr.bf16.mxu0 %v3388_v33 }
 0x9c4   :  { %2036 = vmatpush3.bf16.msra.mxu1 %v3159_v44 }
 0x9c5   :  { %2037 = vmatprep.subr.bf16.mxu1 %v3390_v45  ;;  %1331 = vmatpush1.bf16.msra.mxu0 %v3046_v25 }
 0x9c6   :  { %1332 = vmatprep.subr.bf16.mxu0 %v3049_v27 }
 0x9c8   :  { %2038 = vmatpush3.bf16.msra.mxu1 %v3165_v46 }
 0x9c9   :  { %2039 = vmatprep.subr.bf16.mxu1 %v3390_v45  ;;  %1333 = vmatpush1.bf16.msra.mxu0 %v3054_v28 }
 0x9ca   :  { %1334 = vmatprep.subr.bf16.mxu0 %v3057_v31 }
 0x9cc   :  { %2040 = vmatpush3.bf16.msra.mxu1 %v3171_v47 }
 0x9cd   :  { %2041 = vmatprep.subr.bf16.mxu1 %v3390_v45  ;;  %1335 = vmatpush1.bf16.msra.mxu0 %v3062_v32 }
 0x9ce   :  { %1336 = vmatprep.subr.bf16.mxu0 %v3065_v34 }
 0x9d0   :  { %2042 = vmatpush3.bf16.msra.mxu1 %v3177_v2 }
 0x9d1   :  { %2043 = vmatprep.subr.bf16.mxu1 %v3390_v45  ;;  %1337 = vmatpush1.bf16.msra.mxu0 %v3070_v35 }
 0x9d2   :  { %1338 = vmatprep.subr.bf16.mxu0 %v3073_v37 }
 0x9d4   :  { %2044 = vmatpush3.bf16.msra.mxu1 %v3183_v49 }
 0x9d5   :  { %2045 = vmatprep.subr.bf16.mxu1 %v3390_v45  ;;  %1339 = vmatpush1.bf16.msra.mxu0 %v3078_v38 }
 0x9d6   :  { %1340 = vmatprep.subr.bf16.mxu0 %v3081_v39 }
 0x9d8   :  { %2046 = vmatpush3.bf16.msra.mxu1 %v3189_v50 }
 0x9d9   :  { %2047 = vmatprep.subr.bf16.mxu1 %v3390_v45  ;;  %1341 = vmatpush1.bf16.msra.mxu0 %v3193_v54 }
 0x9da   :  { %1342 = vmatprep.subr.bf16.mxu0 %v3196_v56 }
 0x9dc   :  { %2048 = vmatpush3.bf16.msra.mxu1 %v3199_v51 }
 0x9dd   :  { %1369 = vmatprep.subr.bf16.mxu1 %v3089_v40  ;;  %1343 = vmatpush1.bf16.msra.mxu0 %v3203_v59 }
 0x9de   :  { %2053 = vmatprep.subr.bf16.mxu0 %v3390_v45 }
 0xa92   :  { %v1201_v29 = vpop.f32.mrb[28].mxu1  ;;  %v1242_v63 = vpop.f32.mrb[32].mxu0 }
 0xa93   :  { %v1249_v57 = vadd.f32 %v1201_v29, %v1162_v36  ;;  %v1203_v55 = vpop.f32.mrb[29].mxu1  ;;  %v1244_v60 = vpop.f32.mrb[33].mxu0  ;;  %v1251_v0 = vadd.f32 %v1242_v63, %v1164_v21 }
 0xa94   :  { %v1250_v62 = vadd.f32 %v1203_v55, %v1163_v52  ;;  %v1205_v3 = vpop.f32.mrb[30].mxu1  ;;  %v1246_v4 = vpop.f32.mrb[34].mxu0  ;;  %v1252_v15 = vadd.f32 %v1244_v60, %v1165_v22 }
 0xa95   :  { %v1852_v24 = vmul.f32 -1.442695, %v1249_v57  ;;  %v1206_v18 = vpop.f32.mrb[31].mxu1  ;;  %v1247_v26 = vpop.f32.mrb[35].mxu0 }
 0xa96   :  { %v1853_v43 = vmul.f32 -1.442695, %v1250_v62  ;;  %v1854_v48 = vmul.f32 -1.442695, %v1252_v15 }
 0xa97   :  { %2246 = vpow2.f32 %v1852_v24 }
 0xa98   :  { %2248 = vpow2.f32 %v1853_v43 }
 0xa99   :  { %2250 = vpow2.f32 %v1854_v48 }
 0xa9a   :  { %2252 = vtanh.f32 %v1251_v0 }
 0xaa1   :  { %v2247_v59 = vpop.eup %2246 }
 0xaa2   :  { %v2249_v40 = vpop.eup %2248  ;;  %v1256_v36 = vadd.f32 1.0, %v2247_v59 }
 0xaa3   :  { %v1262_v29 = vadd.f32 1.0, %v2249_v40  ;;  %v2251_v52 = vpop.eup %2250 }
 0xaa4   :  { %2254 = vrcp.f32 %v1256_v36  ;;  %v2253_v57 = vpop.eup %2252  ;;  %v1269_v4 = vadd.f32 1.0, %v2251_v52 }
 0xaa5   :  { %2256 = vrcp.f32 %v1262_v29 }
 0xaa6   :  { %2258 = vrcp.f32 %v1269_v4 }
 0xaae   :  { %v2255_v55 = vpop.eup %2254 }
 0xaaf   :  { %v2257_v3 = vpop.eup %2256  ;;  %v1273_v62 = vmul.f32 %v2255_v55, %v2253_v57 }
 0xab0   :  { %v1272_v24 = vmul.f32 %v2257_v3, %v3095_v53  ;;  %v2259_v15 = vpop.eup %2258 }
 0xab2   :  { %v3208_v60 = vadd.f32 %v1273_v62, %v1272_v24 }
 0xab4   :  { %2260 = vtanh.f32 %v3208_v60 }
 0xabe   :  { %v2261_v21 = vpop.eup %2260 }
 0xabf   :  { %v1276_v48 = vmul.f32 %v2261_v21, %v2259_v15 }
 0xac1   :  { %v1277_v59 = vpack.c.bf16 %v1276_v48, %v1276_v48 }
 0xac3   :  { %2050 = vmatmul.mubr.bf16.vlgmr.msra.gmra.mrb[32].mxu1 %v1277_v59 }
 0xac4   :  { %1370 = vmatpush1.bf16.msra.mxu1 %v3098_v5  ;;  %1401 = vmatprep.mubr.bf16.mxu1 %v3388_v33 }
 0xac5   :  { %1371 = vmatprep.subr.bf16.mxu1 %v3102_v8 }
 0xac8   :  { %1372 = vmatpush1.bf16.msra.mxu1 %v3105_v1 }
 0xac9   :  { %1373 = vmatprep.subr.bf16.mxu1 %v3108_v10 }
 0xacc   :  { %1374 = vmatpush1.bf16.msra.mxu1 %v3111_v11 }
 0xacd   :  { %1375 = vmatprep.subr.bf16.mxu1 %v3114_v14 }
 0xad0   :  { %1376 = vmatpush1.bf16.msra.mxu1 %v3117_v16 }
 0xad1   :  { %1377 = vmatprep.subr.bf16.mxu1 %v3120_v19 }
 0xad4   :  { %1378 = vmatpush1.bf16.msra.mxu1 %v3123_v41 }
 0xad5   :  { %1379 = vmatprep.subr.bf16.mxu1 %v3126_v58 }
 0xad8   :  { %1380 = vmatpush1.bf16.msra.mxu1 %v3129_v9 }
 0xad9   :  { %1381 = vmatprep.subr.bf16.mxu1 %v3132_v42 }
 0xadc   :  { %1382 = vmatpush1.bf16.msra.mxu1 %v3135_v12 }
 0xadd   :  { %1383 = vmatprep.subr.bf16.mxu1 %v3138_v13 }
 0xae0   :  { %1384 = vmatpush1.bf16.msra.mxu1 %v3141_v17 }
 0xae1   :  { %1489 = vmatprep.subr.bf16.mxu1 %v3025_v7  ;;  %v3398_v7 = vld [vmem:[#allocation24_spill] sm:$0xff] }
 0xb96   :  { %v1312_v40 = vpop.f32.mrb[32].mxu1 }
 0xb97   :  { %v1327_v53 = vpack.c.bf16 %v1312_v40, %v1312_v40  ;;  %v2051_v63 = vpop.f32.mrb[33].mxu1  ;;  %v3230_v6 = vsel %vm1654_vm1, %v1312_v40, -1e+30 }
 0xb98   :  { %1675 = vmax.xlane.f32.xlu1 %v3230_v6  ;;  %v1315_v18 = vpop.f32.mrb[34].mxu1 }
 0xb99   :  { %v2052_v26 = vpop.f32.mrb[35].mxu1  ;;  %1361 = vmatmul.mubr.bf16.vlgmr.msra.gmra.mrb[36].mxu0 %v1327_v53  ;;  %1402 = vmatmul.mubr.bf16.vlgmr.msra.gmra.mrb[36].mxu1 %v1327_v53 }
 0xb9a   :  { %2054 = vmatpush3.bf16.msra.mxu0 %v3150_v30  ;;  %2069 = vmatprep.mubr.msk.bf16.mxu0 %vm2563_vm0, %v3390_v45 }
 0xb9b   :  { %2055 = vmatprep.subr.bf16.mxu0 %v3390_v45  ;;  %1490 = vmatpush1.bf16.msra.mxu1 %v3037_v20  ;;  %v3399_v20 = vld [vmem:[#allocation29_spill] sm:$0xff] }
 0xb9c   :  { %1491 = vmatprep.subr.bf16.mxu1 %v3040_v23  ;;  %1521 = vmatprep.mubr.bf16.mxu1 %v3388_v33  ;;  %v1321_v23 = vld [vmem:[#allocation5 + $0x60] sm:$0xff] }
 0xb9e   :  { %2056 = vmatpush3.bf16.msra.mxu0 %v3159_v44 }
 0xb9f   :  { %2057 = vmatprep.subr.bf16.mxu0 %v3390_v45  ;;  %1492 = vmatpush1.bf16.msra.mxu1 %v3046_v25  ;;  %v1323_v25 = vunpack.c.l.bf16 %v1321_v23 }
 0xba0   :  { %1493 = vmatprep.subr.bf16.mxu1 %v3049_v27  ;;  %v1324_v27 = vunpack.c.h.bf16 %v1321_v23 }
 0xba2   :  { %2058 = vmatpush3.bf16.msra.mxu0 %v3165_v46 }
 0xba3   :  { %2059 = vmatprep.subr.bf16.mxu0 %v3390_v45  ;;  %1494 = vmatpush1.bf16.msra.mxu1 %v3054_v28 }
 0xba4   :  { %1495 = vmatprep.subr.bf16.mxu1 %v3057_v31 }
 0xba6   :  { %2060 = vmatpush3.bf16.msra.mxu0 %v3171_v47 }
 0xba7   :  { %2061 = vmatprep.subr.bf16.mxu0 %v3390_v45  ;;  %1496 = vmatpush1.bf16.msra.mxu1 %v3062_v32 }
 0xba8   :  { %1497 = vmatprep.subr.bf16.mxu1 %v3065_v34  ;;  %v1322_v34 = vld [vmem:[#allocation5 + $0x68] sm:$0xff] }
 0xba9   :  { %v1326_v36 = vunpack.c.h.bf16 %v1322_v34  ;;  %v1325_v52 = vunpack.c.l.bf16 %v1322_v34 }
 0xbaa   :  { %2062 = vmatpush3.bf16.msra.mxu0 %v3177_v2 }
 0xbab   :  { %2063 = vmatprep.subr.bf16.mxu0 %v3390_v45  ;;  %1498 = vmatpush1.bf16.msra.mxu1 %v3070_v35 }
 0xbac   :  { %1499 = vmatprep.subr.bf16.mxu1 %v3073_v37 }
 0xbae   :  { %2064 = vmatpush3.bf16.msra.mxu0 %v3183_v49 }
 0xbaf   :  { %2065 = vmatprep.subr.bf16.mxu0 %v3390_v45  ;;  %1500 = vmatpush1.bf16.msra.mxu1 %v3078_v38 }
 0xbb0   :  { %1501 = vmatprep.subr.bf16.mxu1 %v3081_v39 }
 0xbb2   :  { %2066 = vmatpush3.bf16.msra.mxu0 %v3189_v50 }
 0xbb3   :  { %2067 = vmatprep.subr.bf16.mxu0 %v3390_v45  ;;  %1502 = vmatpush1.bf16.msra.mxu1 %v3193_v54 }
 0xbb4   :  { %1503 = vmatprep.subr.bf16.mxu1 %v3196_v56 }
 0xbb6   :  { %2068 = vmatpush3.bf16.msra.mxu0 %v3199_v51 }
 0xbb7   :  { %1530 = vmatprep.subr.bf16.mxu0 %v3398_v7  ;;  %1504 = vmatpush1.bf16.msra.mxu1 %v3399_v20 }
 0xbb8   :  { %2073 = vmatprep.subr.bf16.mxu1 %v3390_v45 }
 0xc6c   :  { %v1362_v28 = vpop.f32.mrb[36].mxu0  ;;  %v1403_v31 = vpop.f32.mrb[36].mxu1 }
 0xc6d   :  { %v1410_v32 = vadd.f32 %v1362_v28, %v1323_v25  ;;  %v1364_v35 = vpop.f32.mrb[37].mxu0  ;;  %v1405_v37 = vpop.f32.mrb[37].mxu1  ;;  %v1412_v55 = vadd.f32 %v1403_v31, %v1325_v52 }
 0xc6e   :  { %v1411_v38 = vadd.f32 %v1364_v35, %v1324_v27  ;;  %v1366_v39 = vpop.f32.mrb[38].mxu0  ;;  %v1407_v54 = vpop.f32.mrb[38].mxu1  ;;  %v1413_v29 = vadd.f32 %v1405_v37, %v1326_v36  ;;  %v1483_v36 = vld [vmem:[#allocation5 + $0x78] sm:$0xff] }
 0xc6f   :  { %v1855_v56 = vmul.f32 -1.442695, %v1410_v32  ;;  %v1367_v43 = vpop.f32.mrb[39].mxu0  ;;  %v1408_v22 = vpop.f32.mrb[39].mxu1  ;;  %v1482_v39 = vld [vmem:[#allocation5 + $0x70] sm:$0xff] }
 0xc70   :  { %v1856_v0 = vmul.f32 -1.442695, %v1411_v38  ;;  %v1857_v57 = vmul.f32 -1.442695, %v1413_v29  ;;  %v1484_v54 = vunpack.c.l.bf16 %v1482_v39 }
 0xc71   :  { %2262 = vpow2.f32 %v1855_v56  ;;  %v1485_v56 = vunpack.c.h.bf16 %v1482_v39 }
 0xc72   :  { %2264 = vpow2.f32 %v1856_v0 }
 0xc73   :  { %2266 = vpow2.f32 %v1857_v57 }
 0xc74   :  { %2268 = vtanh.f32 %v1412_v55 }
 0xc7b   :  { %v2263_v3 = vpop.eup %2262 }
 0xc7c   :  { %v2265_v62 = vpop.eup %2264  ;;  %v1417_v4 = vadd.f32 1.0, %v2263_v3 }
 0xc7d   :  { %v1423_v24 = vadd.f32 1.0, %v2265_v62  ;;  %v2267_v15 = vpop.eup %2266 }
 0xc7e   :  { %2270 = vrcp.f32 %v1417_v4  ;;  %v2269_v21 = vpop.eup %2268  ;;  %v1430_v53 = vadd.f32 1.0, %v2267_v15 }
 0xc7f   :  { %2272 = vrcp.f32 %v1423_v24 }
 0xc80   :  { %2274 = vrcp.f32 %v1430_v53 }
 0xc88   :  { %v2271_v48 = vpop.eup %2270 }
 0xc89   :  { %v2273_v59 = vpop.eup %2272  ;;  %v1434_v40 = vmul.f32 %v2271_v48, %v2269_v21  ;;  %v1487_v21 = vunpack.c.h.bf16 %v1483_v36 }
 0xc8a   :  { %v1433_v63 = vmul.f32 %v2273_v59, %v3208_v60  ;;  %v2275_v26 = vpop.eup %2274  ;;  %v1486_v59 = vunpack.c.l.bf16 %v1483_v36 }
 0xc8c   :  { %v3269_v18 = vadd.f32 %v1434_v40, %v1433_v63 }
 0xc8e   :  { %2276 = vtanh.f32 %v3269_v18 }
 0xc98   :  { %v2277_v7 = vpop.eup %2276 }
 0xc99   :  { %v1437_v20 = vmul.f32 %v2277_v7, %v2275_v26 }
 0xc9b   :  { %v1438_v23 = vpack.c.bf16 %v1437_v20, %v1437_v20 }
 0xc9d   :  { %2070 = vmatmul.mubr.bf16.vlgmr.msra.gmra.mrb[40].mxu0 %v1438_v23 }
 0xc9e   :  { %1531 = vmatpush1.bf16.msra.mxu0 %v3098_v5  ;;  %1562 = vmatprep.mubr.bf16.mxu0 %v3388_v33  ;;  %v1666_v33 = vpop.xlane.xlu0 %1665  ;;  %v3400_v5 = vld [vmem:[#allocation25_spill] sm:$0xff] }
 0xc9f   :  { %1532 = vmatprep.subr.bf16.mxu0 %v3102_v8  ;;  %v1681_v8 = vsub.f32 %v3400_v5, %v1666_v33 }
 0xca2   :  { %1533 = vmatpush1.bf16.msra.mxu0 %v3105_v1  ;;  %v3289_v1 = vpop.xlane.xlu0 %1667 }
 0xca3   :  { %1534 = vmatprep.subr.bf16.mxu0 %v3108_v10  ;;  %v1670_v10 = vpop.xlane.xlu1 %1669 }
 0xca6   :  { %1535 = vmatpush1.bf16.msra.mxu0 %v3111_v11  ;;  %v1689_v11 = vmul.f32 1.442695, %v1681_v8 }
 0xca7   :  { %1536 = vmatprep.subr.bf16.mxu0 %v3114_v14  ;;  %v3401_v14 = vld [vmem:[#allocation27_spill] sm:$0xff] }
 0xca8   :  { %2278 = vpow2.f32 %v1689_v11 }
 0xcaa   :  { %1537 = vmatpush1.bf16.msra.mxu0 %v3117_v16  ;;  %v1683_v16 = vsub.f32 %v3401_v14, %v1670_v10 }
 0xcab   :  { %1538 = vmatprep.subr.bf16.mxu0 %v3120_v19  ;;  %v1674_v19 = vpop.xlane.xlu0 %1673 }
 0xcae   :  { %1539 = vmatpush1.bf16.msra.mxu0 %v3123_v41  ;;  %v1693_v41 = vmul.f32 1.442695, %v1683_v16 }
 0xcaf   :  { %1540 = vmatprep.subr.bf16.mxu0 %v3126_v58  ;;  %v3402_v58 = vld [vmem:[#allocation28_spill] sm:$0xff] }
 0xcb0   :  { %2280 = vpow2.f32 %v1693_v41 }
 0xcb2   :  { %1541 = vmatpush1.bf16.msra.mxu0 %v3129_v9  ;;  %v1685_v9 = vsub.f32 %v3402_v58, %v1674_v19  ;;  %v2279_v28 = vpop.eup %2278 }
 0xcb3   :  { %1542 = vmatprep.subr.bf16.mxu0 %v3132_v42 }
 0xcb4   :  { %v1697_v42 = vmul.f32 1.442695, %v1685_v9 }
 0xcb6   :  { %1543 = vmatpush1.bf16.msra.mxu0 %v3135_v12  ;;  %2282 = vpow2.f32 %v1697_v42 }
 0xcb7   :  { %1544 = vmatprep.subr.bf16.mxu0 %v3138_v13 }
 0xcba   :  { %1545 = vmatpush1.bf16.msra.mxu0 %v3141_v17  ;;  %v2281_v31 = vpop.eup %2280 }
 0xcc0   :  { %v2283_v32 = vpop.eup %2282 }
 0xd70   :  { %v1473_v12 = vpop.f32.mrb[40].mxu0 }
 0xd71   :  { %v1488_v13 = vpack.c.bf16 %v1473_v12, %v1473_v12  ;;  %v2071_v60 = vpop.f32.mrb[41].mxu0  ;;  %v1663_v17 = vsel %vm1654_vm1, %v1473_v12, -1e+30 }
 0xd72   :  { %1677 = vmax.xlane.f32.xlu0 %v1663_v17  ;;  %v1476_v25 = vpop.f32.mrb[42].mxu0  ;;  %v3403_v60 = vld [vmem:[#allocation26_spill] sm:$0xff] }
 0xd73   :  { %v2072_v27 = vpop.f32.mrb[43].mxu0  ;;  %1522 = vmatmul.mubr.bf16.vlgmr.msra.gmra.mrb[40].mxu1 %v1488_v13  ;;  %1563 = vmatmul.mubr.bf16.vlgmr.msra.gmra.mrb[44].mxu0 %v1488_v13  ;;  %v1672_v25 = vpop.xlane.xlu1 %1671 }
 0xd74   :  { %2074 = vmatpush3.bf16.msra.mxu1 %v3150_v30  ;;  %2089 = vmatprep.mubr.msk.bf16.mxu1 %vm2563_vm0, %v3390_v45  ;;  %v3404_v27 = vld [vmem:[#allocation23_spill] sm:$0xff] }
 0xd75   :  { %2075 = vmatprep.subr.bf16.mxu1 %v3390_v45 }
 0xd76   :  { %1705 = vadd.xlane.f32.xlu0 %v2279_v28 }
 0xd78   :  { %2076 = vmatpush3.bf16.msra.mxu1 %v3159_v44 }
 0xd79   :  { %2077 = vmatprep.subr.bf16.mxu1 %v3390_v45 }
 0xd7a   :  { %1709 = vadd.xlane.f32.xlu0 %v2281_v31 }
 0xd7c   :  { %2078 = vmatpush3.bf16.msra.mxu1 %v3165_v46 }
 0xd7d   :  { %2079 = vmatprep.subr.bf16.mxu1 %v3390_v45 }
 0xd7e   :  { %1713 = vadd.xlane.f32.xlu0 %v2283_v32 }
 0xd80   :  { %2080 = vmatpush3.bf16.msra.mxu1 %v3171_v47 }
 0xd81   :  { %2081 = vmatprep.subr.bf16.mxu1 %v3390_v45 }
 0xd84   :  { %2082 = vmatpush3.bf16.msra.mxu1 %v3177_v2 }
 0xd85   :  { %2083 = vmatprep.subr.bf16.mxu1 %v3390_v45 }
 0xd88   :  { %2084 = vmatpush3.bf16.msra.mxu1 %v3183_v49 }
 0xd89   :  { %2085 = vmatprep.subr.bf16.mxu1 %v3390_v45 }
 0xd8c   :  { %2086 = vmatpush3.bf16.msra.mxu1 %v3189_v50 }
 0xd8d   :  { %2087 = vmatprep.subr.bf16.mxu1 %v3390_v45 }
 0xd90   :  { %2088 = vmatpush3.bf16.msra.mxu1 %v3199_v51 }
 0xdff   :  { %v1678_v30 = vpop.xlane.xlu0 %1677 }
 0xe00   :  { %v1687_v44 = vsub.f32 %v1663_v17, %v1678_v30  ;;  %v1682_v17 = vsub.f32 %v3403_v60, %v3289_v1 }
 0xe02   :  { %v1701_v46 = vmul.f32 1.442695, %v1687_v44 }
 0xe03   :  { %v1706_v47 = vpop.xlane.xlu0 %1705 }
 0xe04   :  { %2284 = vpow2.f32 %v1701_v46 }
 0xe05   :  { %2286 = vrcp.f32 %v1706_v47 }
 0xe07   :  { %v1710_v34 = vpop.xlane.xlu0 %1709 }
 0xe08   :  { %2288 = vrcp.f32 %v1710_v34 }
 0xe0b   :  { %v1714_v2 = vpop.xlane.xlu0 %1713 }
 0xe0c   :  { %2290 = vrcp.f32 %v1714_v2 }
 0xe0e   :  { %v2285_v35 = vpop.eup %2284 }
 0xe0f   :  { %v2287_v49 = vpop.eup %2286  ;;  %1717 = vadd.xlane.f32.xlu0 %v2285_v35 }
 0xe10   :  { %v1729_v37 = vmul.f32 %v2287_v49, %v2279_v28  ;;  %v1684_v28 = vsub.f32 %v3404_v27, %v1672_v25 }
 0xe12   :  { %v2289_v50 = vpop.eup %2288  ;;  %1738 = vst.msk [vmem:[#allocation14] sm:$0xff] %vm1737_vm2, %v1729_v37 }
 0xe13   :  { %v1731_v45 = vmul.f32 %v2289_v50, %v2281_v31  ;;  %v1676_v31 = vpop.xlane.xlu1 %1675 }
 0xe14   :  { %v1686_v30 = vsub.f32 %v3230_v6, %v1676_v31 }
 0xe15   :  { %1740 = vst.msk [vmem:[#allocation14 + $0x10] sm:$0xff] %vm1737_vm2, %v1731_v45 }
 0xe16   :  { %v2291_v51 = vpop.eup %2290  ;;  %v1699_v44 = vmul.f32 1.442695, %v1686_v30 }
 0xe17   :  { %v1733_v38 = vmul.f32 %v2291_v51, %v2283_v32  ;;  %v1695_v32 = vmul.f32 1.442695, %v1684_v28 }
 0xe19   :  { %1742 = vst.msk [vmem:[#allocation14 + $0x20] sm:$0xff] %vm1737_vm2, %v1733_v38 }
 0xe46   :  { %v1523_v43 = vpop.f32.mrb[40].mxu1  ;;  %v1564_v22 = vpop.f32.mrb[44].mxu0 }
 0xe47   :  { %v1571_v0 = vadd.f32 %v1523_v43, %v1484_v54  ;;  %v1525_v29 = vpop.f32.mrb[41].mxu1  ;;  %v1566_v52 = vpop.f32.mrb[45].mxu0  ;;  %v1573_v53 = vadd.f32 %v1564_v22, %v1486_v59 }
 0xe48   :  { %v1572_v57 = vadd.f32 %v1525_v29, %v1485_v56  ;;  %v1527_v55 = vpop.f32.mrb[42].mxu1  ;;  %v1568_v3 = vpop.f32.mrb[46].mxu0  ;;  %v1574_v48 = vadd.f32 %v1566_v52, %v1487_v21 }
 0xe49   :  { %v1858_v62 = vmul.f32 -1.442695, %v1571_v0  ;;  %v1528_v4 = vpop.f32.mrb[43].mxu1  ;;  %v1569_v24 = vpop.f32.mrb[47].mxu0 }
 0xe4a   :  { %v1859_v15 = vmul.f32 -1.442695, %v1572_v57  ;;  %v1860_v40 = vmul.f32 -1.442695, %v1574_v48 }
 0xe4b   :  { %2292 = vpow2.f32 %v1858_v62 }
 0xe4c   :  { %2294 = vpow2.f32 %v1859_v15 }
 0xe4d   :  { %2296 = vpow2.f32 %v1860_v40 }
 0xe4e   :  { %2298 = vtanh.f32 %v1573_v53 }
 0xe55   :  { %v2293_v63 = vpop.eup %2292 }
 0xe56   :  { %v2295_v26 = vpop.eup %2294  ;;  %v1578_v7 = vadd.f32 1.0, %v2293_v63 }
 0xe57   :  { %v1584_v20 = vadd.f32 1.0, %v2295_v26  ;;  %v2297_v23 = vpop.eup %2296 }
 0xe58   :  { %2300 = vrcp.f32 %v1578_v7  ;;  %v2299_v33 = vpop.eup %2298  ;;  %v1591_v11 = vadd.f32 1.0, %v2297_v23 }
 0xe59   :  { %2302 = vrcp.f32 %v1584_v20 }
 0xe5a   :  { %2304 = vrcp.f32 %v1591_v11 }
 0xe62   :  { %v2301_v5 = vpop.eup %2300 }
 0xe63   :  { %v2303_v8 = vpop.eup %2302  ;;  %v1595_v10 = vmul.f32 %v2301_v5, %v2299_v33 }
 0xe64   :  { %v1594_v14 = vmul.f32 %v2303_v8, %v3269_v18  ;;  %v2305_v19 = vpop.eup %2304  ;;  %v1691_v18 = vmul.f32 1.442695, %v1682_v17 }
 0xe66   :  { %v1596_v16 = vadd.f32 %v1595_v10, %v1594_v14 }
 0xe68   :  { %1750 = vst [vmem:[#allocation17] sm:$0xff] %v1596_v16  ;;  %2306 = vtanh.f32 %v1596_v16 }
 0xe72   :  { %v2307_v41 = vpop.eup %2306 }
 0xe73   :  { %v1598_v58 = vmul.f32 %v2307_v41, %v2305_v19 }
 0xe75   :  { %v1599_v9 = vpack.c.bf16 %v1598_v58, %v1598_v58 }
 0xe77   :  { %2090 = vmatmul.mubr.bf16.vlgmr.msra.gmra.mrb[44].mxu1 %v1599_v9 }
 0xe9c   :  { %v1718_v42 = vpop.xlane.xlu0 %1717 }
 0xe9d   :  { %2308 = vrcp.f32 %v1718_v42 }
 0xe9e   :  { %2310 = vpow2.f32 %v1691_v18 }
 0xe9f   :  { %2312 = vpow2.f32 %v1695_v32 }
 0xea0   :  { %2314 = vpow2.f32 %v1699_v44 }
 0xea7   :  { %v2309_v12 = vpop.eup %2308 }
 0xea8   :  { %v1735_v13 = vmul.f32 %v2309_v12, %v2285_v35  ;;  %v2311_v35 = vpop.eup %2310 }
 0xea9   :  { %v2313_v49 = vpop.eup %2312 }
 0xeaa   :  { %1744 = vst.msk [vmem:[#allocation14 + $0x30] sm:$0xff] %vm1737_vm2, %v1735_v13  ;;  %v2315_v37 = vpop.eup %2314 }
 0xf4a   :  { %v1634_v46 = vpop.f32.mrb[44].mxu1 }
 0xf4b   :  { %1749 = vst [vmem:[#allocation15] sm:$0xff] %v1634_v46  ;;  %v2091_v47 = vpop.f32.mrb[45].mxu1  ;;  %v1664_v34 = vsel %vm1654_vm1, %v1634_v46, -1e+30 }
 0xf4c   :  { %1679 = vmax.xlane.f32.xlu1 %v1664_v34  ;;  %v1637_v2 = vpop.f32.mrb[46].mxu1 }
 0xf4d   :  { %v2092_v1 = vpop.f32.mrb[47].mxu1 }
 0xf50   :  { %1707 = vadd.xlane.f32.xlu1 %v2311_v35 }
 0xf54   :  { %1711 = vadd.xlane.f32.xlu1 %v2313_v49 }
 0xf58   :  { %1715 = vadd.xlane.f32.xlu1 %v2315_v37 }
 0xfd9   :  { %v1680_v50 = vpop.xlane.xlu1 %1679 }
 0xfda   :  { %v1688_v6 = vsub.f32 %v1664_v34, %v1680_v50 }
 0xfdc   :  { %v1703_v45 = vmul.f32 1.442695, %v1688_v6 }
 0xfdd   :  { %v1708_v51 = vpop.xlane.xlu1 %1707 }
 0xfde   :  { %2316 = vpow2.f32 %v1703_v45 }
 0xfdf   :  { %2318 = vrcp.f32 %v1708_v51 }
 0xfe1   :  { %v1712_v38 = vpop.xlane.xlu1 %1711 }
 0xfe2   :  { %2320 = vrcp.f32 %v1712_v38 }
 0xfe5   :  { %v1716_v61 = vpop.xlane.xlu1 %1715 }
 0xfe6   :  { %2322 = vrcp.f32 %v1716_v61 }
 0xfe8   :  { %v2317_v39 = vpop.eup %2316 }
 0xfe9   :  { %v2319_v54 = vpop.eup %2318  ;;  %1719 = vadd.xlane.f32.xlu1 %v2317_v39 }
 0xfea   :  { %v1730_v56 = vmul.f32 %v2319_v54, %v2311_v35 }
 0xfec   :  { %v2321_v43 = vpop.eup %2320  ;;  %1739 = vst.msk [vmem:[#allocation14 + $0x8] sm:$0xff] %vm1737_vm2, %v1730_v56 }
 0xfed   :  { %v1732_v22 = vmul.f32 %v2321_v43, %v2313_v49 }
 0xfef   :  { %1741 = vst.msk [vmem:[#allocation14 + $0x18] sm:$0xff] %vm1737_vm2, %v1732_v22 }
 0xff0   :  { %v2323_v0 = vpop.eup %2322 }
 0xff1   :  { %v1734_v36 = vmul.f32 %v2323_v0, %v2315_v37 }
 0xff3   :  { %1743 = vst.msk [vmem:[#allocation14 + $0x28] sm:$0xff] %vm1737_vm2, %v1734_v36 }
 0xff4   :  { %2487 = shalt.err (!%p2484_p2)
}
 0xff5   :  { %s2488_s18 = scalar_lea.hbm %s3369_s6, 128 }
 0xff6   :  { %p2489_p3 = scmp.ne.s32.totalorder %s3369_s6, %s2488_s18  ;;  %p2492_p4 = scmp.lt.u32.totalorder %s2488_s18, %s3369_s6 }
 0xff8   :  { %p2494_p5 = pnand %p2492_p4, %p2489_p3 }
 0xffa   :  { %2497 = shalt.err (!%p2494_p5)
}
 0xffb   :  { %1772 = dma.vmem_to_hbm [thread:$0]  %s1770_s13, 128, %s3369_s6, [#allocation16]  }
 0xffc   :  { %s2565_s26 = smov [#allocation17]  }
 0xffd   :  { %s1779_s0 = sshll.u32 %s2565_s26, 4  ;;  %s1780_s0 = int_to_ptr.vmem [resolvable:$true] %s1779_s0 }
 0xffe   :  { %s2498_s16 = scalar_lea.vmem %s1780_s0, 128  ;;  %p2503_p7 = scmp.lt.s32.totalorder %s1780_s0, %s1780_s0 }
 0xfff   :  { %p2499_p6 = scmp.ne.s32.totalorder %s1780_s0, %s2498_s16  ;;  %p2504_p8 = scmp.lt.s32.totalorder %s2498_s16, %s2498_s16 }
0x1001   :  { %p2505_p9 = por %p2504_p8, %p2503_p7 }
0x1003   :  { %p2506_p10 = pnand %p2505_p9, %p2499_p6 }
0x1005   :  { %2509 = shalt.err (!%p2506_p10)
}
0x1006   :  { %s2510_s27 = scalar_lea.hbm %s3370_s7, 128 }
0x1007   :  { %p2511_p11 = scmp.ne.s32.totalorder %s3370_s7, %s2510_s27  ;;  %p2514_p12 = scmp.lt.u32.totalorder %s2510_s27, %s3370_s7 }
0x1009   :  { %p2516_p13 = pnand %p2514_p12, %p2511_p11 }
0x100b   :  { %2519 = shalt.err (!%p2516_p13)
}
0x100c   :  { %1782 = dma.vmem_to_hbm [thread:$0]  %s1780_s0, 128, %s3370_s7, [#allocation16]  }
0x100d   :  { %s2566_s10 = smov [#allocation14]  }
0x100e   :  { %s1756_s2 = sshll.u32 %s2566_s10, 4  ;;  %s1757_s2 = int_to_ptr.vmem [resolvable:$true] %s1756_s2 }
0x100f   :  { %s2520_s11 = scalar_lea.vmem %s1757_s2, 1024  ;;  %p2525_p1 = scmp.lt.s32.totalorder %s1757_s2, %s1757_s2 }
0x1010   :  { %p2521_p0 = scmp.ne.s32.totalorder %s1757_s2, %s2520_s11  ;;  %p2526_p2 = scmp.lt.s32.totalorder %s2520_s11, %s2520_s11 }
0x1012   :  { %p2527_p3 = por %p2526_p2, %p2525_p1 }
0x1014   :  { %p2528_p4 = pnand %p2527_p3, %p2521_p0 }
0x1076   :  { %v1720_v29 = vpop.xlane.xlu1 %1719 }
0x1077   :  { %2324 = vrcp.f32 %v1720_v29 }
0x1081   :  { %v2325_v52 = vpop.eup %2324 }
0x1082   :  { %v1736_v57 = vmul.f32 %v2325_v52, %v2317_v39 }
0x1084   :  { %1745 = vst.msk [vmem:[#allocation14 + $0x38] sm:$0xff] %vm1737_vm2, %v1736_v57 }
0x1085   :  { %2531 = shalt.err (!%p2528_p4)
}
0x1086   :  { %s2532_s7 = scalar_lea.hbm %s3368_s5, 1024 }
0x1087   :  { %p2533_p5 = scmp.ne.s32.totalorder %s3368_s5, %s2532_s7  ;;  %p2536_p6 = scmp.lt.u32.totalorder %s2532_s7, %s3368_s5 }
0x1089   :  { %p2538_p7 = pnand %p2536_p6, %p2533_p5 }
0x108b   :  { %2541 = shalt.err (!%p2538_p7)
}
0x108c   :  { %s2567_s17 = smov 128   ;;  %s2568_s18 = smov 8  }
0x108d   :  { %1762 = dma.vmem_to_hbm [thread:$0]  %s1757_s2, 1024, %s3368_s5, [#allocation7], %s2567_s17, %s2567_s17, %s2568_s18  }
0x108e   :  { %2548 = dma.done.wait [#allocation7], 1024  }
0x108f   :  { %2549 = vsyncadd [#allocation7], 4294966272 }
0x1090   :  { %2550 = dma.done.wait [#allocation16], 256  }
0x1091   :  { %2551 = vsyncadd [#allocation16], 4294967040 }
0x1092   :  { %1792 = vsyncpa [#allocation6], 1 }
0x1093   :  { %1793 = vsyncpa [#allocation9], 1 }
0x1094   :  { %1794 = vsyncpa [#allocation12], 1 }
0x1095   :  { %1795 = vsyncpa [#allocation7], 1 }
0x1096   :  { %1796 = vsyncpa [#allocation16], 1 }

</bundles_post_ra>
